<compile_context>
chip_gen: v7x
topology: tpu7x:2x2x1
jax: 0.10.0
libtpu: 0.0.40
codegen_flags: <defaults>
</compile_context>

<pallas_src>
import functools
import math

import jax
import jax.numpy as jnp
from jax.experimental import pallas as pl
from jax.experimental.pallas import tpu as pltpu


# ----------------------------- in-kernel helpers -----------------------------

def _gelu(x):
    # GPT / HMNet tanh-approximate gelu (x*x*x instead of pow -> stays on VPU).
    c = math.sqrt(2.0 / math.pi)
    return 0.5 * x * (1.0 + jnp.tanh(c * (x + 0.044715 * x * x * x)))


def _layer_norm(x, g, b, eps=1e-5):
    u = jnp.mean(x, axis=-1, keepdims=True)
    s = jnp.mean(jnp.square(x - u), axis=-1, keepdims=True)
    return (x - u) * jax.lax.rsqrt(s + eps) * g + b


# --------------------------------- kernel ------------------------------------

def fused_encoder_kernel(x_ref,
                         wq_ref, bq_ref, wk_ref, bk_ref, wv_ref, bv_ref,
                         woh_ref, bo_ref, g1_ref, b1_ref,
                         wfc_ref, bfc_ref, wpr_ref, bpr_ref, g2_ref, b2_ref,
                         o_ref, h_scr, *, n_head):
    layer = pl.program_id(1)

    # Layer 0 of every batch element: pull the input into the fp32 VMEM
    # residual stream; it stays resident across all n_layer grid steps.
    @pl.when(layer == 0)
    def _():
        h_scr[...] = x_ref[...]

    x = h_scr[...]                                   # [L, D] fp32 residual stream
    L, D = x.shape
    dh = D // n_head
    scale = 1.0 / math.sqrt(dh)
    bf16 = jnp.bfloat16
    f32 = jnp.float32

    xb = x.astype(bf16)

    # Lane-dense q/k/v projections: bf16 MXU inputs, fp32 accumulation.
    q = jnp.dot(xb, wq_ref[...], preferred_element_type=f32) + bq_ref[...]
    k = jnp.dot(xb, wk_ref[...], preferred_element_type=f32) + bk_ref[...]
    v = jnp.dot(xb, wv_ref[...], preferred_element_type=f32) + bv_ref[...]
    q = q * scale       # fold 1/sqrt(dh) into q once, not into each [L, L] score

    # [n_head, L, dh] head-major views (static lane slices stacked on a new
    # leading batch axis) -> batched attention matmuls, softmax vectorized
    # across heads.
    def split_heads(t):
        return jnp.stack([t[:, h * dh:(h + 1) * dh] for h in range(n_head)], axis=0)

    qh = split_heads(q.astype(bf16))
    kh = split_heads(k.astype(bf16))
    vh = split_heads(v.astype(bf16))

    s = jnp.einsum('hqd,hkd->hqk', qh, kh, preferred_element_type=f32)   # [H, L, L]
    s = s - jnp.max(s, axis=-1, keepdims=True)
    p = jnp.exp(s)
    p = p * pl.reciprocal(jnp.sum(p, axis=-1, keepdims=True), approx=True)

    att = jnp.einsum('hqk,hkd->hqd', p.astype(bf16), vh,
                     preferred_element_type=f32)                         # [H, L, dh]

    # Head merge fused into the output projection:
    #   a = sum_h att_h @ Wo[h*dh:(h+1)*dh, :]
    # produced directly as one lane-dense [L, D] tile (no concatenate).
    a = jnp.einsum('hqd,hdo->hqo', att.astype(bf16), woh_ref[...],
                   preferred_element_type=f32)                           # [H, L, D]
    a = jnp.sum(a, axis=0) + bo_ref[...]                                 # [L, D]

    n1 = _layer_norm(x + a, g1_ref[...], b1_ref[...])

    hmid = _gelu(jnp.dot(n1.astype(bf16), wfc_ref[...],
                         preferred_element_type=f32) + bfc_ref[...])
    m = jnp.dot(hmid.astype(bf16), wpr_ref[...],
                preferred_element_type=f32) + bpr_ref[...]

    h_new = _layer_norm(n1 + m, g2_ref[...], b2_ref[...])

    h_scr[...] = h_new                                # carry to the next layer

    @pl.when(layer == pl.num_programs(1) - 1)
    def _():
        o_ref[...] = h_new.astype(o_ref.dtype)        # single lane-dense store


# --------------------------------- wrapper -----------------------------------

def meeting_transformer_encoder(x, packed, n_head):
    """MeetingTransformerEncoder.forward: x [B, L, D] -> [B, L, D]."""
    (wq, bq, wk, bk, wv, bv, wo_h, bo, g1, b1,
     wfc, bfc, wpr, bpr, g2, b2) = packed
    B, L, D = x.shape
    n_layer = wq.shape[0]
    Dff = wfc.shape[-1]
    dh = D // n_head

    def act_map(b, l):      # activation / output: per batch element, layer-invariant
        return (b, 0, 0)

    def w_map(b, l):        # per-layer weights: batch-invariant, pipelined over layers
        return (l, 0, 0)

    def w_map4(b, l):
        return (l, 0, 0, 0)

    in_specs = [
        pl.BlockSpec((None, L, D), act_map),            # x
        pl.BlockSpec((None, D, D), w_map),              # wq
        pl.BlockSpec((None, 1, D), w_map),              # bq
        pl.BlockSpec((None, D, D), w_map),              # wk
        pl.BlockSpec((None, 1, D), w_map),              # bk
        pl.BlockSpec((None, D, D), w_map),              # wv
        pl.BlockSpec((None, 1, D), w_map),              # bv
        pl.BlockSpec((None, n_head, dh, D), w_map4),    # wo (pre-split by head)
        pl.BlockSpec((None, 1, D), w_map),              # bo
        pl.BlockSpec((None, 1, D), w_map),              # ln1 g
        pl.BlockSpec((None, 1, D), w_map),              # ln1 b
        pl.BlockSpec((None, D, Dff), w_map),            # wfc
        pl.BlockSpec((None, 1, Dff), w_map),            # bfc
        pl.BlockSpec((None, Dff, D), w_map),            # wpr
        pl.BlockSpec((None, 1, D), w_map),              # bpr
        pl.BlockSpec((None, 1, D), w_map),              # ln2 g
        pl.BlockSpec((None, 1, D), w_map),              # ln2 b
    ]
    out_spec = pl.BlockSpec((None, L, D), act_map)

    # Advisory cost estimate for XLA's scheduler.
    flops = 2 * B * n_layer * (12 * L * D * D + 2 * L * L * D)
    transcendentals = B * n_layer * (n_head * L * L + 4 * L * D + 4 * L)
    param_bytes = sum(int(p.size) * p.dtype.itemsize for p in packed)
    bytes_accessed = 2 * B * L * D * 4 + B * param_bytes

    kernel = functools.partial(fused_encoder_kernel, n_head=n_head)
    return pl.pallas_call(
        kernel,
        out_shape=jax.ShapeDtypeStruct((B, L, D), jnp.float32),
        grid_spec=pltpu.PrefetchScalarGridSpec(
            num_scalar_prefetch=0,
            grid=(B, n_layer),                       # batch (parallel) x layer (sequential)
            in_specs=in_specs,
            out_specs=out_spec,
            scratch_shapes=[pltpu.VMEM((L, D), jnp.float32)],   # residual stream
        ),
        compiler_params=pltpu.CompilerParams(
            dimension_semantics=("parallel", "arbitrary"),
            vmem_limit_bytes=64 * 1024 * 1024,
        ),
        cost_estimate=pl.CostEstimate(
            flops=int(flops),
            transcendentals=int(transcendentals),
            bytes_accessed=int(bytes_accessed),
        ),
    )(x, *packed)


# ----------------------------- parameter handling -----------------------------

def init_layer_params(key, n_layer, D, std=0.02):
    """Per-layer fp32 params, HMNet init: Conv1D ~ N(0, 0.02), biases 0, LN g=1/b=0."""
    layers = []
    for _ in range(n_layer):
        key, kq, kk, kv, ko, kfc, kpr = jax.random.split(key, 7)
        wq = jax.random.normal(kq, (D, D), jnp.float32) * std
        wk = jax.random.normal(kk, (D, D), jnp.float32) * std
        wv = jax.random.normal(kv, (D, D), jnp.float32) * std
        wo = jax.random.normal(ko, (D, D), jnp.float32) * std
        wfc = jax.random.normal(kfc, (D, 4 * D), jnp.float32) * std
        wpr = jax.random.normal(kpr, (4 * D, D), jnp.float32) * std
        zD = jnp.zeros((1, D), jnp.float32)
        z4D = jnp.zeros((1, 4 * D), jnp.float32)
        ones = jnp.ones((1, D), jnp.float32)
        layers.append((wq, zD, wk, zD, wv, zD, wo, zD,    # attention + biases
                       ones, zD,                           # ln_1 (g, b)
                       wfc, z4D, wpr, zD,                  # mlp
                       ones, zD))                          # ln_2 (g, b)
    return layers


def pack_params(layers, n_head):
    """Stack per-layer params on a leading [n_layer] axis; matmul weights in bf16
    (MXU inputs), biases / LayerNorm params in fp32; Wo pre-split per head."""
    n_layer = len(layers)
    D = layers[0][0].shape[0]
    dh = D // n_head
    bf16 = jnp.bfloat16

    def stack(i):
        return jnp.stack([lay[i] for lay in layers], axis=0)

    return (
        stack(0).astype(bf16),                                   # wq  [nl, D, D]
        stack(1),                                                # bq  [nl, 1, D]
        stack(2).astype(bf16),                                   # wk
        stack(3),                                                # bk
        stack(4).astype(bf16),                                   # wv
        stack(5),                                                # bv
        stack(6).reshape(n_layer, n_head, dh, D).astype(bf16),   # wo  [nl, H, dh, D]
        stack(7),                                                # bo
        stack(8), stack(9),                                      # ln1 g, b
        stack(10).astype(bf16),                                  # wfc [nl, D, 4D]
        stack(11),                                               # bfc [nl, 1, 4D]
        stack(12).astype(bf16),                                  # wpr [nl, 4D, D]
        stack(13),                                               # bpr
        stack(14), stack(15),                                    # ln2 g, b
    )


# ------------------------------ pure-JAX reference ----------------------------

def _ref_forward(x, layers, n_head):
    """fp32 JAX reference with the module's exact semantics."""
    B, L, D = x.shape
    dh = D // n_head
    h = x
    for (wq, bq, wk, bk, wv, bv, wo, bo, g1, b1,
         wfc, bfc, wpr, bpr, g2, b2) in layers:
        q = h @ wq + bq
        k = h @ wk + bk
        v = h @ wv + bv
        qh = q.reshape(B, L, n_head, dh).transpose(0, 2, 1, 3)
        kh = k.reshape(B, L, n_head, dh).transpose(0, 2, 1, 3)
        vh = v.reshape(B, L, n_head, dh).transpose(0, 2, 1, 3)
        w = jnp.einsum("bhqd,bhkd->bhqk", qh, kh) / math.sqrt(dh)
        w = jax.nn.softmax(w, axis=-1)
        a = jnp.einsum("bhqk,bhkd->bhqd", w, vh).transpose(0, 2, 1, 3).reshape(B, L, D)
        a = a @ wo + bo
        n = _layer_norm(h + a, g1, b1)
        m = _gelu(n @ wfc + bfc) @ wpr + bpr
        h = _layer_norm(n + m, g2, b2)
    return h


# ----------------------------------- main -------------------------------------

if __name__ == "__main__":
    # small shapes consistent with the module: batch x len x transformer_embed_dim
    B, L, D = 2, 8, 32
    N_HEAD = 4        # opt['TRANSFORMER_HEAD']
    N_LAYER = 2       # opt['WORLDLEVEL_LAYER']

    key = jax.random.PRNGKey(0)
    kx, kp = jax.random.split(key)
    x = jax.random.normal(kx, (B, L, D), jnp.float32)

    layers = init_layer_params(kp, N_LAYER, D)
    packed = pack_params(layers, N_HEAD)

    out = meeting_transformer_encoder(x, packed, N_HEAD)
    out = jax.block_until_ready(out)

    ref = _ref_forward(x, layers, N_HEAD)
    assert out.shape == (B, L, D)
    max_err = float(jnp.max(jnp.abs(out - ref)))
    # bf16 matmul inputs vs fp32 reference: residual stream stays fp32 in-kernel,
    # so the deviation is small; 2e-2 leaves ample margin.
    assert jnp.allclose(out, ref, atol=2e-2, rtol=2e-2), (
        f"mismatch vs fp32 reference (max abs err {max_err:.3e})")

    print("KERNEL_OK")
</pallas_src>

<mosaic_0001>
module attributes {stable_mosaic.version = 11 : i64} {
  func.func @fused_encoder_kernel(%arg0: i32, %arg1: i32, %arg2: memref<1x8x32xf32, #tpu.memory_space<vmem>>, %arg3: memref<1x32x32xbf16, #tpu.memory_space<vmem>>, %arg4: memref<1x1x32xf32, #tpu.memory_space<vmem>>, %arg5: memref<1x32x32xbf16, #tpu.memory_space<vmem>>, %arg6: memref<1x1x32xf32, #tpu.memory_space<vmem>>, %arg7: memref<1x32x32xbf16, #tpu.memory_space<vmem>>, %arg8: memref<1x1x32xf32, #tpu.memory_space<vmem>>, %arg9: memref<1x4x8x32xbf16, #tpu.memory_space<vmem>>, %arg10: memref<1x1x32xf32, #tpu.memory_space<vmem>>, %arg11: memref<1x1x32xf32, #tpu.memory_space<vmem>>, %arg12: memref<1x1x32xf32, #tpu.memory_space<vmem>>, %arg13: memref<1x32x128xbf16, #tpu.memory_space<vmem>>, %arg14: memref<1x1x128xf32, #tpu.memory_space<vmem>>, %arg15: memref<1x128x32xbf16, #tpu.memory_space<vmem>>, %arg16: memref<1x1x32xf32, #tpu.memory_space<vmem>>, %arg17: memref<1x1x32xf32, #tpu.memory_space<vmem>>, %arg18: memref<1x1x32xf32, #tpu.memory_space<vmem>>, %arg19: memref<1x8x32xf32, #tpu.memory_space<vmem>>, %arg20: memref<8x32xf32, #tpu.memory_space<vmem>>) attributes {dimension_semantics = [#tpu.dimension_semantics<parallel>, #tpu.dimension_semantics<arbitrary>], iteration_bounds = array<i64: 2, 2>, scalar_prefetch = 0 : i64, scratch_operands = 1 : i64, tpu.core_type = #tpu.core_type<tc>, window_params = [{transform_indices = @transform_0, window_bounds = array<i64: 1, 8, 32>}, {transform_indices = @transform_1, window_bounds = array<i64: 1, 32, 32>}, {transform_indices = @transform_2, window_bounds = array<i64: 1, 1, 32>}, {transform_indices = @transform_3, window_bounds = array<i64: 1, 32, 32>}, {transform_indices = @transform_4, window_bounds = array<i64: 1, 1, 32>}, {transform_indices = @transform_5, window_bounds = array<i64: 1, 32, 32>}, {transform_indices = @transform_6, window_bounds = array<i64: 1, 1, 32>}, {transform_indices = @transform_7, window_bounds = array<i64: 1, 4, 8, 32>}, {transform_indices = @transform_8, window_bounds = array<i64: 1, 1, 32>}, {transform_indices = @transform_9, window_bounds = array<i64: 1, 1, 32>}, {transform_indices = @transform_10, window_bounds = array<i64: 1, 1, 32>}, {transform_indices = @transform_11, window_bounds = array<i64: 1, 32, 128>}, {transform_indices = @transform_12, window_bounds = array<i64: 1, 1, 128>}, {transform_indices = @transform_13, window_bounds = array<i64: 1, 128, 32>}, {transform_indices = @transform_14, window_bounds = array<i64: 1, 1, 32>}, {transform_indices = @transform_15, window_bounds = array<i64: 1, 1, 32>}, {transform_indices = @transform_16, window_bounds = array<i64: 1, 1, 32>}, {transform_indices = @transform_17, window_bounds = array<i64: 1, 8, 32>}]} {
    %c0_i32 = arith.constant 0 : i32
    %0 = arith.cmpi eq, %arg1, %c0_i32 : i32
    %1 = arith.extui %0 : i1 to i32
    %c0_i32_0 = arith.constant 0 : i32
    %2 = arith.cmpi ne, %1, %c0_i32_0 : i32
    scf.if %2 {
      %c0_79 = arith.constant 0 : index
      %c0_80 = arith.constant 0 : index
      %c0_81 = arith.constant 0 : index
      %167 = vector.load %arg2[%c0_79, %c0_80, %c0_81] : memref<1x8x32xf32, #tpu.memory_space<vmem>>, vector<1x8x32xf32>
      %168 = vector.shape_cast %167 : vector<1x8x32xf32> to vector<8x32xf32>
      %c0_82 = arith.constant 0 : index
      %c0_83 = arith.constant 0 : index
      %169 = vector.load %arg20[%c0_82, %c0_83] : memref<8x32xf32, #tpu.memory_space<vmem>>, vector<8x32xf32>
      tpu.vector_store %arg20[%c0_82, %c0_83], %168 {strides = array<i32>} : memref<8x32xf32, #tpu.memory_space<vmem>>, vector<8x32xf32>,
    } else {
    }
    %c0 = arith.constant 0 : index
    %c0_1 = arith.constant 0 : index
    %3 = vector.load %arg20[%c0, %c0_1] : memref<8x32xf32, #tpu.memory_space<vmem>>, vector<8x32xf32>
    %4 = arith.truncf %3 : vector<8x32xf32> to vector<8x32xbf16>
    %c0_2 = arith.constant 0 : index
    %c0_3 = arith.constant 0 : index
    %c0_4 = arith.constant 0 : index
    %5 = vector.load %arg3[%c0_2, %c0_3, %c0_4] : memref<1x32x32xbf16, #tpu.memory_space<vmem>>, vector<1x32x32xbf16>
    %6 = vector.shape_cast %5 : vector<1x32x32xbf16> to vector<32x32xbf16>
    %cst = arith.constant dense<0.000000e+00> : vector<8x32xf32>
    %7 = tpu.matmul %4, %6, %cst {dimension_numbers = #tpu.dot_dimension_numbers<[1], [0], [0], [1], [0, 0, 1, 1], [], []>} : vector<8x32xbf16>, vector<32x32xbf16>, vector<8x32xf32> -> vector<8x32xf32>
    %c0_5 = arith.constant 0 : index
    %c0_6 = arith.constant 0 : index
    %c0_7 = arith.constant 0 : index
    %8 = vector.load %arg4[%c0_5, %c0_6, %c0_7] : memref<1x1x32xf32, #tpu.memory_space<vmem>>, vector<1x1x32xf32>
    %9 = vector.shape_cast %8 : vector<1x1x32xf32> to vector<1x32xf32>
    %10 = vector.broadcast %9 : vector<1x32xf32> to vector<8x32xf32>
    %11 = arith.addf %7, %10 : vector<8x32xf32>
    %c0_8 = arith.constant 0 : index
    %c0_9 = arith.constant 0 : index
    %c0_10 = arith.constant 0 : index
    %12 = vector.load %arg5[%c0_8, %c0_9, %c0_10] : memref<1x32x32xbf16, #tpu.memory_space<vmem>>, vector<1x32x32xbf16>
    %13 = vector.shape_cast %12 : vector<1x32x32xbf16> to vector<32x32xbf16>
    %cst_11 = arith.constant dense<0.000000e+00> : vector<8x32xf32>
    %14 = tpu.matmul %4, %13, %cst_11 {dimension_numbers = #tpu.dot_dimension_numbers<[1], [0], [0], [1], [0, 0, 1, 1], [], []>} : vector<8x32xbf16>, vector<32x32xbf16>, vector<8x32xf32> -> vector<8x32xf32>
    %c0_12 = arith.constant 0 : index
    %c0_13 = arith.constant 0 : index
    %c0_14 = arith.constant 0 : index
    %15 = vector.load %arg6[%c0_12, %c0_13, %c0_14] : memref<1x1x32xf32, #tpu.memory_space<vmem>>, vector<1x1x32xf32>
    %16 = vector.shape_cast %15 : vector<1x1x32xf32> to vector<1x32xf32>
    %17 = vector.broadcast %16 : vector<1x32xf32> to vector<8x32xf32>
    %18 = arith.addf %14, %17 : vector<8x32xf32>
    %c0_15 = arith.constant 0 : index
    %c0_16 = arith.constant 0 : index
    %c0_17 = arith.constant 0 : index
    %19 = vector.load %arg7[%c0_15, %c0_16, %c0_17] : memref<1x32x32xbf16, #tpu.memory_space<vmem>>, vector<1x32x32xbf16>
    %20 = vector.shape_cast %19 : vector<1x32x32xbf16> to vector<32x32xbf16>
    %cst_18 = arith.constant dense<0.000000e+00> : vector<8x32xf32>
    %21 = tpu.matmul %4, %20, %cst_18 {dimension_numbers = #tpu.dot_dimension_numbers<[1], [0], [0], [1], [0, 0, 1, 1], [], []>} : vector<8x32xbf16>, vector<32x32xbf16>, vector<8x32xf32> -> vector<8x32xf32>
    %c0_19 = arith.constant 0 : index
    %c0_20 = arith.constant 0 : index
    %c0_21 = arith.constant 0 : index
    %22 = vector.load %arg8[%c0_19, %c0_20, %c0_21] : memref<1x1x32xf32, #tpu.memory_space<vmem>>, vector<1x1x32xf32>
    %23 = vector.shape_cast %22 : vector<1x1x32xf32> to vector<1x32xf32>
    %24 = vector.broadcast %23 : vector<1x32xf32> to vector<8x32xf32>
    %25 = arith.addf %21, %24 : vector<8x32xf32>
    %cst_22 = arith.constant 0.353553385 : f32
    %26 = vector.broadcast %cst_22 : f32 to vector<8x32xf32>
    %27 = arith.mulf %11, %26 : vector<8x32xf32>
    %28 = arith.truncf %27 : vector<8x32xf32> to vector<8x32xbf16>
    %29 = vector.extract_strided_slice %28 {offsets = [0, 0], sizes = [8, 8], strides = [1, 1]} : vector<8x32xbf16> to vector<8x8xbf16>
    %30 = vector.extract_strided_slice %28 {offsets = [0, 8], sizes = [8, 8], strides = [1, 1]} : vector<8x32xbf16> to vector<8x8xbf16>
    %31 = vector.extract_strided_slice %28 {offsets = [0, 16], sizes = [8, 8], strides = [1, 1]} : vector<8x32xbf16> to vector<8x8xbf16>
    %32 = vector.extract_strided_slice %28 {offsets = [0, 24], sizes = [8, 8], strides = [1, 1]} : vector<8x32xbf16> to vector<8x8xbf16>
    %33 = vector.shape_cast %29 : vector<8x8xbf16> to vector<1x8x8xbf16>
    %34 = vector.shape_cast %30 : vector<8x8xbf16> to vector<1x8x8xbf16>
    %35 = vector.shape_cast %31 : vector<8x8xbf16> to vector<1x8x8xbf16>
    %36 = vector.shape_cast %32 : vector<8x8xbf16> to vector<1x8x8xbf16>
    %37 = tpu.concatenate %33, %34, %35, %36 in 0 : vector<1x8x8xbf16>, vector<1x8x8xbf16>, vector<1x8x8xbf16>, vector<1x8x8xbf16> -> vector<4x8x8xbf16>
    %38 = arith.truncf %18 : vector<8x32xf32> to vector<8x32xbf16>
    %39 = vector.extract_strided_slice %38 {offsets = [0, 0], sizes = [8, 8], strides = [1, 1]} : vector<8x32xbf16> to vector<8x8xbf16>
    %40 = vector.extract_strided_slice %38 {offsets = [0, 8], sizes = [8, 8], strides = [1, 1]} : vector<8x32xbf16> to vector<8x8xbf16>
    %41 = vector.extract_strided_slice %38 {offsets = [0, 16], sizes = [8, 8], strides = [1, 1]} : vector<8x32xbf16> to vector<8x8xbf16>
    %42 = vector.extract_strided_slice %38 {offsets = [0, 24], sizes = [8, 8], strides = [1, 1]} : vector<8x32xbf16> to vector<8x8xbf16>
    %43 = vector.shape_cast %39 : vector<8x8xbf16> to vector<1x8x8xbf16>
    %44 = vector.shape_cast %40 : vector<8x8xbf16> to vector<1x8x8xbf16>
    %45 = vector.shape_cast %41 : vector<8x8xbf16> to vector<1x8x8xbf16>
    %46 = vector.shape_cast %42 : vector<8x8xbf16> to vector<1x8x8xbf16>
    %47 = tpu.concatenate %43, %44, %45, %46 in 0 : vector<1x8x8xbf16>, vector<1x8x8xbf16>, vector<1x8x8xbf16>, vector<1x8x8xbf16> -> vector<4x8x8xbf16>
    %48 = arith.truncf %25 : vector<8x32xf32> to vector<8x32xbf16>
    %49 = vector.extract_strided_slice %48 {offsets = [0, 0], sizes = [8, 8], strides = [1, 1]} : vector<8x32xbf16> to vector<8x8xbf16>
    %50 = vector.extract_strided_slice %48 {offsets = [0, 8], sizes = [8, 8], strides = [1, 1]} : vector<8x32xbf16> to vector<8x8xbf16>
    %51 = vector.extract_strided_slice %48 {offsets = [0, 16], sizes = [8, 8], strides = [1, 1]} : vector<8x32xbf16> to vector<8x8xbf16>
    %52 = vector.extract_strided_slice %48 {offsets = [0, 24], sizes = [8, 8], strides = [1, 1]} : vector<8x32xbf16> to vector<8x8xbf16>
    %53 = vector.shape_cast %49 : vector<8x8xbf16> to vector<1x8x8xbf16>
    %54 = vector.shape_cast %50 : vector<8x8xbf16> to vector<1x8x8xbf16>
    %55 = vector.shape_cast %51 : vector<8x8xbf16> to vector<1x8x8xbf16>
    %56 = vector.shape_cast %52 : vector<8x8xbf16> to vector<1x8x8xbf16>
    %57 = tpu.concatenate %53, %54, %55, %56 in 0 : vector<1x8x8xbf16>, vector<1x8x8xbf16>, vector<1x8x8xbf16>, vector<1x8x8xbf16> -> vector<4x8x8xbf16>
    "tpu.trace_start"() <{level = 10 : i32, message = "hqd,hkd->hqk"}> : () -> ()
    %cst_23 = arith.constant dense<0.000000e+00> : vector<4x8x8xf32>
    %58 = tpu.matmul %37, %47, %cst_23 {dimension_numbers = #tpu.dot_dimension_numbers<[2], [2], [1], [1], [0, 0, 0, 1, 1, 1], [0], [0]>} : vector<4x8x8xbf16>, vector<4x8x8xbf16>, vector<4x8x8xf32> -> vector<4x8x8xf32>
    "tpu.trace_stop"() : () -> ()
    %cst_24 = arith.constant dense<0xFF800000> : vector<4x8xf32>
    %59 = vector.multi_reduction <maximumf>, %58, %cst_24 [2] : vector<4x8x8xf32> to vector<4x8xf32>
    %60 = vector.shape_cast %59 : vector<4x8xf32> to vector<4x8x1xf32>
    %61 = vector.broadcast %60 : vector<4x8x1xf32> to vector<4x8x8xf32>
    %62 = arith.subf %58, %61 : vector<4x8x8xf32>
    %63 = math.exp %62 : vector<4x8x8xf32>
    %cst_25 = arith.constant dense<0.000000e+00> : vector<4x8xf32>
    %64 = vector.multi_reduction <add>, %63, %cst_25 [2] : vector<4x8x8xf32> to vector<4x8xf32>
    %65 = vector.shape_cast %64 : vector<4x8xf32> to vector<4x8x1xf32>
    %66 = tpu.reciprocal %65 {approx = true} : vector<4x8x1xf32> -> vector<4x8x1xf32>
    %67 = vector.broadcast %66 : vector<4x8x1xf32> to vector<4x8x8xf32>
    %68 = arith.mulf %63, %67 : vector<4x8x8xf32>
    %69 = arith.truncf %68 : vector<4x8x8xf32> to vector<4x8x8xbf16>
    "tpu.trace_start"() <{level = 10 : i32, message = "hqk,hkd->hqd"}> : () -> ()
    %cst_26 = arith.constant dense<0.000000e+00> : vector<4x8x8xf32>
    %70 = tpu.matmul %69, %57, %cst_26 {dimension_numbers = #tpu.dot_dimension_numbers<[2], [1], [1], [2], [0, 0, 0, 1, 1, 2], [0], [0]>} : vector<4x8x8xbf16>, vector<4x8x8xbf16>, vector<4x8x8xf32> -> vector<4x8x8xf32>
    "tpu.trace_stop"() : () -> ()
    %71 = arith.truncf %70 : vector<4x8x8xf32> to vector<4x8x8xbf16>
    %c0_27 = arith.constant 0 : index
    %c0_28 = arith.constant 0 : index
    %c0_29 = arith.constant 0 : index
    %c0_30 = arith.constant 0 : index
    %72 = vector.load %arg9[%c0_27, %c0_28, %c0_29, %c0_30] : memref<1x4x8x32xbf16, #tpu.memory_space<vmem>>, vector<1x4x8x32xbf16>
    %73 = vector.shape_cast %72 : vector<1x4x8x32xbf16> to vector<4x8x32xbf16>
    "tpu.trace_start"() <{level = 10 : i32, message = "hqd,hdo->hqo"}> : () -> ()
    %cst_31 = arith.constant dense<0.000000e+00> : vector<4x8x32xf32>
    %74 = tpu.matmul %71, %73, %cst_31 {dimension_numbers = #tpu.dot_dimension_numbers<[2], [1], [1], [2], [0, 0, 0, 1, 1, 2], [0], [0]>} : vector<4x8x8xbf16>, vector<4x8x32xbf16>, vector<4x8x32xf32> -> vector<4x8x32xf32>
    "tpu.trace_stop"() : () -> ()
    %cst_32 = arith.constant dense<0.000000e+00> : vector<8x32xf32>
    %75 = vector.multi_reduction <add>, %74, %cst_32 [0] : vector<4x8x32xf32> to vector<8x32xf32>
    %c0_33 = arith.constant 0 : index
    %c0_34 = arith.constant 0 : index
    %c0_35 = arith.constant 0 : index
    %76 = vector.load %arg10[%c0_33, %c0_34, %c0_35] : memref<1x1x32xf32, #tpu.memory_space<vmem>>, vector<1x1x32xf32>
    %77 = vector.shape_cast %76 : vector<1x1x32xf32> to vector<1x32xf32>
    %78 = vector.broadcast %77 : vector<1x32xf32> to vector<8x32xf32>
    %79 = arith.addf %75, %78 : vector<8x32xf32>
    %80 = arith.addf %3, %79 : vector<8x32xf32>
    %c0_36 = arith.constant 0 : index
    %c0_37 = arith.constant 0 : index
    %c0_38 = arith.constant 0 : index
    %81 = vector.load %arg11[%c0_36, %c0_37, %c0_38] : memref<1x1x32xf32, #tpu.memory_space<vmem>>, vector<1x1x32xf32>
    %82 = vector.shape_cast %81 : vector<1x1x32xf32> to vector<1x32xf32>
    %c0_39 = arith.constant 0 : index
    %c0_40 = arith.constant 0 : index
    %c0_41 = arith.constant 0 : index
    %83 = vector.load %arg12[%c0_39, %c0_40, %c0_41] : memref<1x1x32xf32, #tpu.memory_space<vmem>>, vector<1x1x32xf32>
    %84 = vector.shape_cast %83 : vector<1x1x32xf32> to vector<1x32xf32>
    %cst_42 = arith.constant dense<0.000000e+00> : vector<8xf32>
    %85 = vector.multi_reduction <add>, %80, %cst_42 [1] : vector<8x32xf32> to vector<8xf32>
    %86 = vector.shape_cast %85 : vector<8xf32> to vector<8x1xf32>
    %cst_43 = arith.constant 3.200000e+01 : f32
    %87 = vector.broadcast %cst_43 : f32 to vector<8x1xf32>
    %88 = arith.divf %86, %87 : vector<8x1xf32>
    %89 = vector.broadcast %88 : vector<8x1xf32> to vector<8x32xf32>
    %90 = arith.subf %80, %89 : vector<8x32xf32>
    %91 = arith.mulf %90, %90 : vector<8x32xf32>
    %cst_44 = arith.constant dense<0.000000e+00> : vector<8xf32>
    %92 = vector.multi_reduction <add>, %91, %cst_44 [1] : vector<8x32xf32> to vector<8xf32>
    %93 = vector.shape_cast %92 : vector<8xf32> to vector<8x1xf32>
    %cst_45 = arith.constant 3.200000e+01 : f32
    %94 = vector.broadcast %cst_45 : f32 to vector<8x1xf32>
    %95 = arith.divf %93, %94 : vector<8x1xf32>
    %96 = vector.broadcast %88 : vector<8x1xf32> to vector<8x32xf32>
    %97 = arith.subf %80, %96 : vector<8x32xf32>
    %cst_46 = arith.constant 9.99999974E-6 : f32
    %98 = vector.broadcast %cst_46 : f32 to vector<8x1xf32>
    %99 = arith.addf %95, %98 : vector<8x1xf32>
    %100 = math.rsqrt %99 : vector<8x1xf32>
    %101 = vector.broadcast %100 : vector<8x1xf32> to vector<8x32xf32>
    %102 = arith.mulf %97, %101 : vector<8x32xf32>
    %103 = vector.broadcast %82 : vector<1x32xf32> to vector<8x32xf32>
    %104 = arith.mulf %102, %103 : vector<8x32xf32>
    %105 = vector.broadcast %84 : vector<1x32xf32> to vector<8x32xf32>
    %106 = arith.addf %104, %105 : vector<8x32xf32>
    %107 = arith.truncf %106 : vector<8x32xf32> to vector<8x32xbf16>
    %c0_47 = arith.constant 0 : index
    %c0_48 = arith.constant 0 : index
    %c0_49 = arith.constant 0 : index
    %108 = vector.load %arg13[%c0_47, %c0_48, %c0_49] : memref<1x32x128xbf16, #tpu.memory_space<vmem>>, vector<1x32x128xbf16>
    %109 = vector.shape_cast %108 : vector<1x32x128xbf16> to vector<32x128xbf16>
    %cst_50 = arith.constant dense<0.000000e+00> : vector<8x128xf32>
    %110 = tpu.matmul %107, %109, %cst_50 {dimension_numbers = #tpu.dot_dimension_numbers<[1], [0], [0], [1], [0, 0, 1, 1], [], []>} : vector<8x32xbf16>, vector<32x128xbf16>, vector<8x128xf32> -> vector<8x128xf32>
    %c0_51 = arith.constant 0 : index
    %c0_52 = arith.constant 0 : index
    %c0_53 = arith.constant 0 : index
    %111 = vector.load %arg14[%c0_51, %c0_52, %c0_53] : memref<1x1x128xf32, #tpu.memory_space<vmem>>, vector<1x1x128xf32>
    %112 = vector.shape_cast %111 : vector<1x1x128xf32> to vector<1x128xf32>
    %113 = vector.broadcast %112 : vector<1x128xf32> to vector<8x128xf32>
    %114 = arith.addf %110, %113 : vector<8x128xf32>
    %cst_54 = arith.constant 5.000000e-01 : f32
    %115 = vector.broadcast %cst_54 : f32 to vector<8x128xf32>
    %116 = arith.mulf %115, %114 : vector<8x128xf32>
    %cst_55 = arith.constant 4.471500e-02 : f32
    %117 = vector.broadcast %cst_55 : f32 to vector<8x128xf32>
    %118 = arith.mulf %117, %114 : vector<8x128xf32>
    %119 = arith.mulf %118, %114 : vector<8x128xf32>
    %120 = arith.mulf %119, %114 : vector<8x128xf32>
    %121 = arith.addf %114, %120 : vector<8x128xf32>
    %cst_56 = arith.constant 0.797884583 : f32
    %122 = vector.broadcast %cst_56 : f32 to vector<8x128xf32>
    %123 = arith.mulf %122, %121 : vector<8x128xf32>
    %124 = math.tanh %123 : vector<8x128xf32>
    %cst_57 = arith.constant 1.000000e+00 : f32
    %125 = vector.broadcast %cst_57 : f32 to vector<8x128xf32>
    %126 = arith.addf %125, %124 : vector<8x128xf32>
    %127 = arith.mulf %116, %126 : vector<8x128xf32>
    %128 = arith.truncf %127 : vector<8x128xf32> to vector<8x128xbf16>
    %c0_58 = arith.constant 0 : index
    %c0_59 = arith.constant 0 : index
    %c0_60 = arith.constant 0 : index
    %129 = vector.load %arg15[%c0_58, %c0_59, %c0_60] : memref<1x128x32xbf16, #tpu.memory_space<vmem>>, vector<1x128x32xbf16>
    %130 = vector.shape_cast %129 : vector<1x128x32xbf16> to vector<128x32xbf16>
    %cst_61 = arith.constant dense<0.000000e+00> : vector<8x32xf32>
    %131 = tpu.matmul %128, %130, %cst_61 {dimension_numbers = #tpu.dot_dimension_numbers<[1], [0], [0], [1], [0, 0, 1, 1], [], []>} : vector<8x128xbf16>, vector<128x32xbf16>, vector<8x32xf32> -> vector<8x32xf32>
    %c0_62 = arith.constant 0 : index
    %c0_63 = arith.constant 0 : index
    %c0_64 = arith.constant 0 : index
    %132 = vector.load %arg16[%c0_62, %c0_63, %c0_64] : memref<1x1x32xf32, #tpu.memory_space<vmem>>, vector<1x1x32xf32>
    %133 = vector.shape_cast %132 : vector<1x1x32xf32> to vector<1x32xf32>
    %134 = vector.broadcast %133 : vector<1x32xf32> to vector<8x32xf32>
    %135 = arith.addf %131, %134 : vector<8x32xf32>
    %136 = arith.addf %106, %135 : vector<8x32xf32>
    %c0_65 = arith.constant 0 : index
    %c0_66 = arith.constant 0 : index
    %c0_67 = arith.constant 0 : index
    %137 = vector.load %arg17[%c0_65, %c0_66, %c0_67] : memref<1x1x32xf32, #tpu.memory_space<vmem>>, vector<1x1x32xf32>
    %138 = vector.shape_cast %137 : vector<1x1x32xf32> to vector<1x32xf32>
    %c0_68 = arith.constant 0 : index
    %c0_69 = arith.constant 0 : index
    %c0_70 = arith.constant 0 : index
    %139 = vector.load %arg18[%c0_68, %c0_69, %c0_70] : memref<1x1x32xf32, #tpu.memory_space<vmem>>, vector<1x1x32xf32>
    %140 = vector.shape_cast %139 : vector<1x1x32xf32> to vector<1x32xf32>
    %cst_71 = arith.constant dense<0.000000e+00> : vector<8xf32>
    %141 = vector.multi_reduction <add>, %136, %cst_71 [1] : vector<8x32xf32> to vector<8xf32>
    %142 = vector.shape_cast %141 : vector<8xf32> to vector<8x1xf32>
    %cst_72 = arith.constant 3.200000e+01 : f32
    %143 = vector.broadcast %cst_72 : f32 to vector<8x1xf32>
    %144 = arith.divf %142, %143 : vector<8x1xf32>
    %145 = vector.broadcast %144 : vector<8x1xf32> to vector<8x32xf32>
    %146 = arith.subf %136, %145 : vector<8x32xf32>
    %147 = arith.mulf %146, %146 : vector<8x32xf32>
    %cst_73 = arith.constant dense<0.000000e+00> : vector<8xf32>
    %148 = vector.multi_reduction <add>, %147, %cst_73 [1] : vector<8x32xf32> to vector<8xf32>
    %149 = vector.shape_cast %148 : vector<8xf32> to vector<8x1xf32>
    %cst_74 = arith.constant 3.200000e+01 : f32
    %150 = vector.broadcast %cst_74 : f32 to vector<8x1xf32>
    %151 = arith.divf %149, %150 : vector<8x1xf32>
    %152 = vector.broadcast %144 : vector<8x1xf32> to vector<8x32xf32>
    %153 = arith.subf %136, %152 : vector<8x32xf32>
    %cst_75 = arith.constant 9.99999974E-6 : f32
    %154 = vector.broadcast %cst_75 : f32 to vector<8x1xf32>
    %155 = arith.addf %151, %154 : vector<8x1xf32>
    %156 = math.rsqrt %155 : vector<8x1xf32>
    %157 = vector.broadcast %156 : vector<8x1xf32> to vector<8x32xf32>
    %158 = arith.mulf %153, %157 : vector<8x32xf32>
    %159 = vector.broadcast %138 : vector<1x32xf32> to vector<8x32xf32>
    %160 = arith.mulf %158, %159 : vector<8x32xf32>
    %161 = vector.broadcast %140 : vector<1x32xf32> to vector<8x32xf32>
    %162 = arith.addf %160, %161 : vector<8x32xf32>
    %c0_76 = arith.constant 0 : index
    %c0_77 = arith.constant 0 : index
    %163 = vector.load %arg20[%c0_76, %c0_77] : memref<8x32xf32, #tpu.memory_space<vmem>>, vector<8x32xf32>
    tpu.vector_store %arg20[%c0_76, %c0_77], %162 {strides = array<i32>} : memref<8x32xf32, #tpu.memory_space<vmem>>, vector<8x32xf32>,
    %c1_i32 = arith.constant 1 : i32
    %164 = arith.cmpi eq, %arg1, %c1_i32 : i32
    %165 = arith.extui %164 : i1 to i32
    %c0_i32_78 = arith.constant 0 : i32
    %166 = arith.cmpi ne, %165, %c0_i32_78 : i32
    scf.if %166 {
      %c0_79 = arith.constant 0 : index
      %c0_80 = arith.constant 0 : index
      %c0_81 = arith.constant 0 : index
      %167 = vector.load %arg19[%c0_79, %c0_80, %c0_81] : memref<1x8x32xf32, #tpu.memory_space<vmem>>, vector<1x8x32xf32>
      %168 = vector.shape_cast %167 : vector<1x8x32xf32> to vector<8x32xf32>
      %169 = vector.shape_cast %162 : vector<8x32xf32> to vector<1x8x32xf32>
      tpu.vector_store %arg19[%c0_79, %c0_80, %c0_81], %169 {strides = array<i32>} : memref<1x8x32xf32, #tpu.memory_space<vmem>>, vector<1x8x32xf32>,
    } else {
    }
    return
  }
  func.func @transform_0(%arg0: i32, %arg1: i32) -> (i32, i32, i32) {
    %c0_i32 = arith.constant 0 : i32
    %c0_i32_0 = arith.constant 0 : i32
    %c0_i32_1 = arith.constant 0 : i32
    return %arg0, %c0_i32, %c0_i32_0 : i32, i32, i32
  }
  func.func @transform_1(%arg0: i32, %arg1: i32) -> (i32, i32, i32) {
    %c0_i32 = arith.constant 0 : i32
    %c0_i32_0 = arith.constant 0 : i32
    %c0_i32_1 = arith.constant 0 : i32
    return %arg1, %c0_i32, %c0_i32_0 : i32, i32, i32
  }
  func.func @transform_2(%arg0: i32, %arg1: i32) -> (i32, i32, i32) {
    %c0_i32 = arith.constant 0 : i32
    %c0_i32_0 = arith.constant 0 : i32
    %c0_i32_1 = arith.constant 0 : i32
    return %arg1, %c0_i32, %c0_i32_0 : i32, i32, i32
  }
  func.func @transform_3(%arg0: i32, %arg1: i32) -> (i32, i32, i32) {
    %c0_i32 = arith.constant 0 : i32
    %c0_i32_0 = arith.constant 0 : i32
    %c0_i32_1 = arith.constant 0 : i32
    return %arg1, %c0_i32, %c0_i32_0 : i32, i32, i32
  }
  func.func @transform_4(%arg0: i32, %arg1: i32) -> (i32, i32, i32) {
    %c0_i32 = arith.constant 0 : i32
    %c0_i32_0 = arith.constant 0 : i32
    %c0_i32_1 = arith.constant 0 : i32
    return %arg1, %c0_i32, %c0_i32_0 : i32, i32, i32
  }
  func.func @transform_5(%arg0: i32, %arg1: i32) -> (i32, i32, i32) {
    %c0_i32 = arith.constant 0 : i32
    %c0_i32_0 = arith.constant 0 : i32
    %c0_i32_1 = arith.constant 0 : i32
    return %arg1, %c0_i32, %c0_i32_0 : i32, i32, i32
  }
  func.func @transform_6(%arg0: i32, %arg1: i32) -> (i32, i32, i32) {
    %c0_i32 = arith.constant 0 : i32
    %c0_i32_0 = arith.constant 0 : i32
    %c0_i32_1 = arith.constant 0 : i32
    return %arg1, %c0_i32, %c0_i32_0 : i32, i32, i32
  }
  func.func @transform_7(%arg0: i32, %arg1: i32) -> (i32, i32, i32, i32) {
    %c0_i32 = arith.constant 0 : i32
    %c0_i32_0 = arith.constant 0 : i32
    %c0_i32_1 = arith.constant 0 : i32
    %c0_i32_2 = arith.constant 0 : i32
    return %arg1, %c0_i32, %c0_i32_0, %c0_i32_1 : i32, i32, i32, i32
  }
  func.func @transform_8(%arg0: i32, %arg1: i32) -> (i32, i32, i32) {
    %c0_i32 = arith.constant 0 : i32
    %c0_i32_0 = arith.constant 0 : i32
    %c0_i32_1 = arith.constant 0 : i32
    return %arg1, %c0_i32, %c0_i32_0 : i32, i32, i32
  }
  func.func @transform_9(%arg0: i32, %arg1: i32) -> (i32, i32, i32) {
    %c0_i32 = arith.constant 0 : i32
    %c0_i32_0 = arith.constant 0 : i32
    %c0_i32_1 = arith.constant 0 : i32
    return %arg1, %c0_i32, %c0_i32_0 : i32, i32, i32
  }
  func.func @transform_10(%arg0: i32, %arg1: i32) -> (i32, i32, i32) {
    %c0_i32 = arith.constant 0 : i32
    %c0_i32_0 = arith.constant 0 : i32
    %c0_i32_1 = arith.constant 0 : i32
    return %arg1, %c0_i32, %c0_i32_0 : i32, i32, i32
  }
  func.func @transform_11(%arg0: i32, %arg1: i32) -> (i32, i32, i32) {
    %c0_i32 = arith.constant 0 : i32
    %c0_i32_0 = arith.constant 0 : i32
    %c0_i32_1 = arith.constant 0 : i32
    return %arg1, %c0_i32, %c0_i32_0 : i32, i32, i32
  }
  func.func @transform_12(%arg0: i32, %arg1: i32) -> (i32, i32, i32) {
    %c0_i32 = arith.constant 0 : i32
    %c0_i32_0 = arith.constant 0 : i32
    %c0_i32_1 = arith.constant 0 : i32
    return %arg1, %c0_i32, %c0_i32_0 : i32, i32, i32
  }
  func.func @transform_13(%arg0: i32, %arg1: i32) -> (i32, i32, i32) {
    %c0_i32 = arith.constant 0 : i32
    %c0_i32_0 = arith.constant 0 : i32
    %c0_i32_1 = arith.constant 0 : i32
    return %arg1, %c0_i32, %c0_i32_0 : i32, i32, i32
  }
  func.func @transform_14(%arg0: i32, %arg1: i32) -> (i32, i32, i32) {
    %c0_i32 = arith.constant 0 : i32
    %c0_i32_0 = arith.constant 0 : i32
    %c0_i32_1 = arith.constant 0 : i32
    return %arg1, %c0_i32, %c0_i32_0 : i32, i32, i32
  }
  func.func @transform_15(%arg0: i32, %arg1: i32) -> (i32, i32, i32) {
    %c0_i32 = arith.constant 0 : i32
    %c0_i32_0 = arith.constant 0 : i32
    %c0_i32_1 = arith.constant 0 : i32
    return %arg1, %c0_i32, %c0_i32_0 : i32, i32, i32
  }
  func.func @transform_16(%arg0: i32, %arg1: i32) -> (i32, i32, i32) {
    %c0_i32 = arith.constant 0 : i32
    %c0_i32_0 = arith.constant 0 : i32
    %c0_i32_1 = arith.constant 0 : i32
    return %arg1, %c0_i32, %c0_i32_0 : i32, i32, i32
  }
  func.func @transform_17(%arg0: i32, %arg1: i32) -> (i32, i32, i32) {
    %c0_i32 = arith.constant 0 : i32
    %c0_i32_0 = arith.constant 0 : i32
    %c0_i32_1 = arith.constant 0 : i32
    return %arg0, %c0_i32, %c0_i32_0 : i32, i32, i32
  }
}

</mosaic_0001>

<bundles_post_ra>
// kernel: tpu_custom_call.1
= control target key start
LH: loop header
LB: loop body
LE: loop exit
PB: predicated region body
PF: predicated region fallthrough
CT: control target
= control target key end

     0   :  { %s4827_s0 = inlined_call_operand.hbm [shape: f32[2,8,32], index: 0, kind: input, shape index: {}]   ;;  %s4828_s1 = inlined_call_operand.hbm [shape: bf16[2,32,32], index: 1, kind: input, shape index: {}]   ;;  %s4829_s2 = inlined_call_operand.hbm [shape: f32[2,1,32], index: 2, kind: input, shape index: {}]   ;;  %s4830_s3 = inlined_call_operand.hbm [shape: bf16[2,32,32], index: 3, kind: input, shape index: {}]   ;;  %s4831_s4 = inlined_call_operand.hbm [shape: f32[2,1,32], index: 4, kind: input, shape index: {}]   ;;  %s4832_s5 = inlined_call_operand.hbm [shape: bf16[2,32,32], index: 5, kind: input, shape index: {}]   ;;  %s4833_s6 = inlined_call_operand.hbm [shape: f32[2,1,32], index: 6, kind: input, shape index: {}]   ;;  %s4834_s7 = inlined_call_operand.hbm [shape: bf16[2,4,8,32], index: 7, kind: input, shape index: {}]   ;;  %s4835_s8 = inlined_call_operand.hbm [shape: f32[2,1,32], index: 8, kind: input, shape index: {}]   ;;  %s4836_s9 = inlined_call_operand.hbm [shape: f32[2,1,32], index: 9, kind: input, shape index: {}]   ;;  %s4837_s10 = inlined_call_operand.hbm [shape: f32[2,1,32], index: 10, kind: input, shape index: {}]   ;;  %s4838_s11 = inlined_call_operand.hbm [shape: bf16[2,32,128], index: 11, kind: input, shape index: {}]   ;;  %s4839_s12 = inlined_call_operand.hbm [shape: f32[2,1,128], index: 12, kind: input, shape index: {}]   ;;  %s4840_s13 = inlined_call_operand.hbm [shape: bf16[2,128,32], index: 13, kind: input, shape index: {}]   ;;  %s4841_s14 = inlined_call_operand.hbm [shape: f32[2,1,32], index: 14, kind: input, shape index: {}]   ;;  %s4842_s15 = inlined_call_operand.hbm [shape: f32[2,1,32], index: 15, kind: input, shape index: {}]   ;;  %s4843_s16 = inlined_call_operand.hbm [shape: f32[2,1,32], index: 16, kind: input, shape index: {}]   ;;  %s4844_s17 = inlined_call_operand.hbm [shape: f32[2,8,32], index: 17, kind: output, shape index: {}]  }
   0x1   :  { %4886 = sst [smem:[#allocation56_spill]] %s4827_s0 }
   0x2   :  { %4887 = sst [smem:[#allocation57_spill]] %s4828_s1 }
   0x3   :  { %4888 = sst [smem:[#allocation58_spill]] %s4829_s2 }
   0x4   :  { %4889 = sst [smem:[#allocation59_spill]] %s4830_s3 }
   0x5   :  { %4890 = sst [smem:[#allocation60_spill]] %s4831_s4 }
   0x6   :  { %4891 = sst [smem:[#allocation61_spill]] %s4832_s5 }
   0x7   :  { %4892 = sst [smem:[#allocation62_spill]] %s4833_s6 }
   0x8   :  { %4893 = sst [smem:[#allocation63_spill]] %s4835_s8 }
   0x9   :  { %4894 = sst [smem:[#allocation64_spill]] %s4837_s10 }
   0xa   :  { %4895 = sst [smem:[#allocation65_spill]] %s4839_s12 }
   0xb   :  { %4896 = sst [smem:[#allocation66_spill]] %s4841_s14 }
   0xc   :  { %4897 = sst [smem:[#allocation67_spill]] %s4843_s16 }
   0xd   :  { %4898 = sst [smem:[#allocation68_spill]] %s4844_s17 }
   0xe   :  { %22 = vsyncpa [#allocation4], 0 }
   0xf   :  { %24 = vsyncpa [#allocation4 + $0x1], 0 }
  0x10   :  { %25 = vsyncpa [#allocation7], 0 }
  0x11   :  { %27 = vsyncpa [#allocation7 + $0x1], 0 }
  0x12   :  { %28 = vsyncpa [#allocation10], 0 }
  0x13   :  { %30 = vsyncpa [#allocation10 + $0x1], 0 }
  0x14   :  { %31 = vsyncpa [#allocation13], 0 }
  0x15   :  { %33 = vsyncpa [#allocation13 + $0x1], 0 }
  0x16   :  { %34 = vsyncpa [#allocation16], 0 }
  0x17   :  { %36 = vsyncpa [#allocation16 + $0x1], 0 }
  0x18   :  { %37 = vsyncpa [#allocation19], 0 }
  0x19   :  { %39 = vsyncpa [#allocation19 + $0x1], 0 }
  0x1a   :  { %40 = vsyncpa [#allocation22], 0 }
  0x1b   :  { %42 = vsyncpa [#allocation22 + $0x1], 0 }
  0x1c   :  { %43 = vsyncpa [#allocation25], 0 }
  0x1d   :  { %45 = vsyncpa [#allocation25 + $0x1], 0 }
  0x1e   :  { %46 = vsyncpa [#allocation28], 0 }
  0x1f   :  { %48 = vsyncpa [#allocation28 + $0x1], 0 }
  0x20   :  { %49 = vsyncpa [#allocation5], 0 }
  0x21   :  { %51 = vsyncpa [#allocation5 + $0x1], 0  ;;  %s3836_s24 = smov 0   ;;  %s3838_s25 = smov 0  }
  0x22   :  { %s3840_s26 = smov 0   ;;  %s3842_s27 = smov 0  }
  0x23   :  { %s3844_s28 = smov 0   ;;  %s3846_s29 = smov 0  }
  0x24   :  { %s3848_s0 = smov 0   ;;  %s3850_s30 = smov 0  }
  0x25   :  { %s3852_s18 = smov 0   ;;  %s3854_s19 = smov 0  }
  0x26   :  { %s3856_s1 = smov 0  }
  0x27 LB: > { %4899 = sst [smem:[#allocation41_spill]] %s3683_s25  ;;  %s3892_s20 = sadd.s32 4294967295, %s3719_s1   ;;  %s3719_s1 = sphi %s3856_s1, %s57_s1   ;;  %s3715_s19 = sphi %s3854_s19, %s4990_s19   ;;  %s3711_s18 = sphi %s3852_s18, %s4989_s18   ;;  %s3707_s30 = sphi %s3850_s30, %s4988_s30   ;;  %s3703_s0 = sphi %s3848_s0, %s4987_s0   ;;  %s3699_s29 = sphi %s3846_s29, %s4986_s29   ;;  %s3695_s28 = sphi %s3844_s28, %s4985_s28   ;;  %s3691_s27 = sphi %s3842_s27, %s4981_s27   ;;  %s3687_s26 = sphi %s3840_s26, %s4980_s26   ;;  %s3683_s25 = sphi %s3838_s25, %s4979_s25   ;;  %s3679_s24 = sphi %s3836_s24, %s4978_s24  }
  0x28   : > { %4900 = sst [smem:[#allocation42_spill]] %s3687_s26  ;;  %s2650_s21 = sadd.s32 4294967294, %s3719_s1  }
  0x29   : > { %4901 = sst [smem:[#allocation43_spill]] %s3691_s27  ;;  %s66_s22 = sadd.s32 1, %s3711_s18 }
  0x2a   : > { %4902 = sst [smem:[#allocation44_spill]] %s3695_s28  ;;  %s69_s23 = sadd.s32 1, %s3715_s19 }
  0x2b   : > { %4903 = sst [smem:[#allocation45_spill]] %s3703_s0  ;;  %p67_p0 = scmp.ge.s32.totalorder %s66_s22, 2 }
  0x2c   : > { %4904 = sst [smem:[#allocation46_spill]] %s3707_s30  ;;  %s76_s17 = sadd.s32 1, %s3699_s29 }
  0x2d   : > { %4905 = sst [smem:[#allocation47_spill]] %s3892_s20  ;;  %p83_p1 = scmp.ne.s32.totalorder %s3699_s29, %s3695_s28 }
  0x2e   : > { %p84_p2 = scmp.eq.s32.totalorder %s3719_s1, 0  ;;  %s4992_s22 = smov (%p67_p0, %s66_s22), 0 }
  0x2f   : > { %4906 = sst [smem:[#allocation48_spill]] %s4992_s22  ;;  %s4994_s23 = smov (!%p67_p0, %s69_s23), %s3715_s19 }
  0x30   : > { %p3909_p3 = por %p84_p2, %p83_p1  ;;  %p4855_p4 = scmp.ne.s32.totalorder %s3695_s28, %s3691_s27 }
  0x31   : > { %p71_p5 = scmp.ge.s32.totalorder %s4994_s23, 2  ;;  %p90_p6 = scmp.eq.s32.totalorder %s3892_s20, 0 }
  0x32   : > { %s4907_s30 = scalar_select %p3909_p3, 1, 0 }
  0x33   : > { %s99_s0 = ssub.s32 %s3711_s18, %s4992_s22  ;;  %s102_s16 = sadd.s32 1, %s3687_s26 }
  0x34   : > { %s4996_s23 = smov (%p71_p5, %s4994_s23), 0  ;;  %p3926_p7 = por %p90_p6, %p4855_p4 }
  0x35   : > { %4908 = sst [smem:[#allocation49_spill]] %s4996_s23  ;;  %p100_p8 = scmp.eq.s32.totalorder %s99_s0, 0 }
  0x36   : > { %s4909_s14 = scalar_select %p3926_p7, 1, 0 }
  0x37   : > { %s73_s12 = ssub.s32 %s3715_s19, %s4996_s23  ;;  %p109_p9 = scmp.ne.s32.totalorder %s3687_s26, %s3683_s25 }
  0x38   : > { %4910 = sst [smem:[#allocation50_spill]] %s4909_s14  ;;  %p74_p10 = scmp.eq.s32.totalorder %s73_s12, 0 }
  0x39   : > { %p115_p11 = scmp.ne.s32.totalorder %s3683_s25, %s3679_s24  ;;  %p3944_p12 = por %p109_p9, %p84_p2 }
  0x3a   : > { %s3937_s10 = scalar_select %p100_p8, %s3687_s26, %s102_s16  }
  0x3b   : > { %s3940_s22 = scalar_select %p74_p10, %s3699_s29, %s76_s17  }
  0x3c   : > { %4911 = sst [smem:[#allocation51_spill]] %s3937_s10  ;;  %p3950_p13 = por %p115_p11, %p90_p6 }
  0x3d   : > { %4912 = sst [smem:[#allocation52_spill]] %s3940_s22  ;;  %p529_p0 = scmp.eq.s32.totalorder %s3892_s20, 3 }
  0x3e   : > { %s4913_s8 = scalar_select %p3944_p12, 1, 0 }
  0x3f   : > { %s4914_s6 = scalar_select %p3950_p13, 1, 0 }
  0x40   : > { %p535_p5 = scmp.eq.s32.totalorder %s2650_s21, 3  ;;  %p3958_p4 = por %p529_p0, %p83_p1 }
  0x41   : > { %4915 = sst [smem:[#allocation53_spill]] %s4914_s6  ;;  %p4918_p8 = scmp.ne.s32.totalorder %s3695_s28, %s3691_s27 }
  0x42   : > { %s4916_s12 = scalar_select %p3958_p4, 1, 0 }
  0x43   : > { %p3965_p10 = por %p535_p5, %p4918_p8  ;;  %p2652_p2 = scmp.ge.s32.totalorder %s3719_s1, 4 }
  0x44   : > { %4917 = sst [smem:[#allocation54_spill]] %s4916_s12  ;;  %s3971_s17 = sand.u32 (!%p2652_p2), 1, %s3719_s1  }
  0x45   : > { %s4919_s16 = scalar_select %p3965_p10, 1, 0 }
  0x46   : > { %551 = sbr.rel (%p2652_p2) target bundleno = 529 (0x211), region = 16  ;;  %s3974_s24 = sand.u32 (!%p2652_p2), 1, %s3687_s26  }
  0x47   : > { %4920 = sst [smem:[#allocation55_spill]] %s4919_s16  ;;  %s3977_s0 = sshll.u32 (!%p2652_p2), %s3974_s24, 4 }
  0x48   : > { %s3980_s21 = sshll.u32 (!%p2652_p2), %s3711_s18, 8  ;;  %s4921_s10 = sld [smem:[#allocation57_spill]] (!%p2652_p2) }
  0x49   : > { %s577_s27 = scalar_lea.vmem (!%p2652_p2), [#allocation6], %s3977_s0  ;;  %s4873_s26 = scalar_lea.sflag (!%p2652_p2), [#allocation7], %s3971_s17 }
  0x4a   : > { %s584_s12 = sshll.u32 (!%p2652_p2), %s577_s27, 4  ;;  %s3989_s12 = int_to_ptr.vmem [resolvable:$true] %s584_s12 }
  0x4e   : > { %s3986_s16 = scalar_lea.hbm %s4921_s10, %s3980_s21  ;;  %s3093_s22 = scalar_lea.hbm %s4921_s10, 512 }
  0x4f   : > { %s3089_s6 = scalar_lea.hbm %s3986_s16, 256  ;;  %p3094_p11 = scmp.lt.u32.totalorder %s3986_s16, %s4921_s10 }
  0x50   : > { %p3090_p1 = scmp.ne.s32.totalorder %s3986_s16, %s3089_s6  ;;  %p3095_p0 = scmp.lt.u32.totalorder %s3093_s22, %s3089_s6 }
  0x51   : > { %p3097_p8 = scmp.lt.u32.totalorder %s3089_s6, %s3986_s16 }
  0x52   : > { %p3091_p6 = pnand %p3090_p1, %p3944_p12  ;;  %p3096_p5 = por %p3095_p0, %p3094_p11 }
  0x54   : > { %p3092_p9 = pneg %p3091_p6  ;;  %p3098_p2 = por %p3097_p8, %p3096_p5 }
  0x56   : > { %p3099_p10 = pnand %p3098_p2, %p3092_p9 }
  0x58   : > { %3102 = shalt.err (!%p3099_p10)
}
  0x59   : > { %s3103_s27 = scalar_lea.vmem %s3989_s12, 256  ;;  %s3721_s25 = smov [#allocation6]  }
  0x5a   : > { %p3104_p1 = scmp.ne.s32.totalorder %s3989_s12, %s3103_s27  ;;  %s3107_s20 = sshll.u32 %s3721_s25, 4  ;;  %s3108_s20 = int_to_ptr.vmem [resolvable:$false] %s3107_s20 }
  0x5b   : > { %s3109_s14 = scalar_lea.vmem %s3108_s20, 512  ;;  %p3110_p13 = scmp.lt.s32.totalorder %s3989_s12, %s3108_s20 }
  0x5c   : > { %p3105_p6 = pnand %p3104_p1, %p3944_p12  ;;  %p3111_p7 = scmp.lt.s32.totalorder %s3109_s14, %s3103_s27 }
  0x5e   : > { %p3106_p4 = pneg %p3105_p6  ;;  %p3112_p11 = por %p3111_p7, %p3110_p13 }
  0x60   : > { %p3113_p0 = pnand %p3112_p11, %p3106_p4 }
  0x62   : > { %3116 = shalt.err (!%p3113_p0)
}
  0x63   : > { %s4877_s6 = smov 64   ;;  %s3723_s22 = smov 4  }
  0x64   : > { %2916 = dma.hbm_to_vmem [thread:$0]  (%p3944_p12), %s3986_s16, 256, %s3989_s12, %s4873_s26, %s4877_s6, %s4877_s6, %s3723_s22  }
  0x65   : > { %s4922_s3 = sld [smem:[#allocation59_spill]]  ;;  %s615_s20 = scalar_lea.vmem [#allocation9], %s3977_s0 }
  0x66   : > { %s622_s14 = sshll.u32 %s615_s20, 4  ;;  %s4874_s10 = scalar_lea.sflag [#allocation10], %s3971_s17  ;;  %s4025_s14 = int_to_ptr.vmem [resolvable:$true] %s622_s14 }
  0x6b   : > { %s4022_s25 = scalar_lea.hbm %s4922_s3, %s3980_s21  ;;  %s3121_s23 = scalar_lea.hbm %s4922_s3, 512 }
  0x6c   : > { %s3117_s28 = scalar_lea.hbm %s4022_s25, 256  ;;  %p3122_p10 = scmp.lt.u32.totalorder %s4022_s25, %s4922_s3 }
  0x6d   : > { %p3118_p4 = scmp.ne.s32.totalorder %s4022_s25, %s3117_s28  ;;  %p3123_p9 = scmp.lt.u32.totalorder %s3121_s23, %s3117_s28 }
  0x6e   : > { %p3125_p8 = scmp.lt.u32.totalorder %s3117_s28, %s4022_s25 }
  0x6f   : > { %p3119_p7 = pnand %p3118_p4, %p3944_p12  ;;  %p3124_p5 = por %p3123_p9, %p3122_p10 }
  0x71   : > { %p3120_p13 = pneg %p3119_p7  ;;  %p3126_p2 = por %p3125_p8, %p3124_p5 }
  0x73   : > { %p3127_p1 = pnand %p3126_p2, %p3120_p13 }
  0x75   : > { %3130 = shalt.err (!%p3127_p1)
}
  0x76   : > { %s3131_s20 = scalar_lea.vmem %s4025_s14, 256  ;;  %s3724_s12 = smov [#allocation9]  }
  0x77   : > { %p3132_p6 = scmp.ne.s32.totalorder %s4025_s14, %s3131_s20  ;;  %s3135_s16 = sshll.u32 %s3724_s12, 4  ;;  %s3136_s16 = int_to_ptr.vmem [resolvable:$false] %s3135_s16 }
  0x78   : > { %s3137_s26 = scalar_lea.vmem %s3136_s16, 512  ;;  %p3138_p4 = scmp.lt.s32.totalorder %s4025_s14, %s3136_s16 }
  0x79   : > { %p3133_p11 = pnand %p3132_p6, %p3944_p12  ;;  %p3139_p7 = scmp.lt.s32.totalorder %s3137_s26, %s3131_s20 }
  0x7b   : > { %p3134_p0 = pneg %p3133_p11  ;;  %p3140_p10 = por %p3139_p7, %p3138_p4 }
  0x7d   : > { %p3141_p9 = pnand %p3140_p10, %p3134_p0 }
  0x7f   : > { %3144 = shalt.err (!%p3141_p9)
}
  0x80   : > { %2918 = dma.hbm_to_vmem [thread:$0]  (%p3944_p12), %s4022_s25, 256, %s4025_s14, %s4874_s10, %s4877_s6, %s4877_s6, %s3723_s22  }
  0x81   : > { %s4923_s5 = sld [smem:[#allocation61_spill]]  ;;  %s653_s20 = scalar_lea.vmem [#allocation12], %s3977_s0 }
  0x82   : > { %s660_s12 = sshll.u32 %s653_s20, 4  ;;  %s4875_s16 = scalar_lea.sflag [#allocation13], %s3971_s17  ;;  %s4061_s12 = int_to_ptr.vmem [resolvable:$true] %s660_s12 }
  0x87   : > { %s4058_s27 = scalar_lea.hbm %s4923_s5, %s3980_s21  ;;  %s3149_s28 = scalar_lea.hbm %s4923_s5, 512 }
  0x88   : > { %s3145_s26 = scalar_lea.hbm %s4058_s27, 256  ;;  %p3150_p2 = scmp.lt.u32.totalorder %s4058_s27, %s4923_s5 }
  0x89   : > { %p3146_p13 = scmp.ne.s32.totalorder %s4058_s27, %s3145_s26  ;;  %p3151_p1 = scmp.lt.u32.totalorder %s3149_s28, %s3145_s26 }
  0x8a   : > { %p3153_p11 = scmp.lt.u32.totalorder %s3145_s26, %s4058_s27 }
  0x8b   : > { %p3147_p5 = pnand %p3146_p13, %p3944_p12  ;;  %p3152_p6 = por %p3151_p1, %p3150_p2 }
  0x8d   : > { %p3148_p8 = pneg %p3147_p5  ;;  %p3154_p0 = por %p3153_p11, %p3152_p6 }
  0x8f   : > { %p3155_p4 = pnand %p3154_p0, %p3148_p8 }
  0x91   : > { %3158 = shalt.err (!%p3155_p4)
}
  0x92   : > { %s3159_s20 = scalar_lea.vmem %s4061_s12, 256  ;;  %s3725_s25 = smov [#allocation12]  }
  0x93   : > { %p3160_p7 = scmp.ne.s32.totalorder %s4061_s12, %s3159_s20  ;;  %s3163_s14 = sshll.u32 %s3725_s25, 4  ;;  %s3164_s14 = int_to_ptr.vmem [resolvable:$false] %s3163_s14 }
  0x94   : > { %s3165_s10 = scalar_lea.vmem %s3164_s14, 512  ;;  %p3166_p13 = scmp.lt.s32.totalorder %s4061_s12, %s3164_s14 }
  0x95   : > { %p3161_p10 = pnand %p3160_p7, %p3944_p12  ;;  %p3167_p5 = scmp.lt.s32.totalorder %s3165_s10, %s3159_s20 }
  0x97   : > { %p3162_p9 = pneg %p3161_p10  ;;  %p3168_p2 = por %p3167_p5, %p3166_p13 }
  0x99   : > { %p3169_p1 = pnand %p3168_p2, %p3162_p9 }
  0x9b   : > { %3172 = shalt.err (!%p3169_p1)
}
  0x9c   : > { %2920 = dma.hbm_to_vmem [thread:$0]  (%p3944_p12), %s4058_s27, 256, %s4061_s12, %s4875_s16, %s4877_s6, %s4877_s6, %s3723_s22  }
  0x9d   : > { %s4094_s23 = scalar_lea.hbm %s4834_s7, %s3980_s21  ;;  %s691_s20 = scalar_lea.vmem [#allocation15], %s3977_s0 }
  0x9e   : > { %s698_s25 = sshll.u32 %s691_s20, 4  ;;  %s4098_s14 = sshll.u32 %s3711_s18, 4  ;;  %s4100_s25 = int_to_ptr.vmem [resolvable:$true] %s698_s25 }
  0x9f   : > { %s4876_s10 = scalar_lea.sflag [#allocation16], %s3971_s17  ;;  %s3173_s3 = scalar_lea.hbm %s4094_s23, 256 }
  0xa0   : > { %p3174_p8 = scmp.ne.s32.totalorder %s4094_s23, %s3173_s3  ;;  %s3177_s26 = scalar_lea.hbm %s4834_s7, 512 }
  0xa1   : > { %p3178_p0 = scmp.lt.u32.totalorder %s4094_s23, %s4834_s7  ;;  %p3179_p4 = scmp.lt.u32.totalorder %s3177_s26, %s3173_s3 }
  0xa2   : > { %p3175_p6 = pnand %p3174_p8, %p3944_p12  ;;  %p3181_p10 = scmp.lt.u32.totalorder %s3173_s3, %s4094_s23 }
  0xa3   : > { %p3180_p7 = por %p3179_p4, %p3178_p0 }
  0xa4   : > { %p3176_p11 = pneg %p3175_p6 }
  0xa5   : > { %p3182_p9 = por %p3181_p10, %p3180_p7 }
  0xa7   : > { %p3183_p13 = pnand %p3182_p9, %p3176_p11 }
  0xa9   : > { %3186 = shalt.err (!%p3183_p13)
}
  0xaa   : > { %s3187_s20 = scalar_lea.vmem %s4100_s25, 256  ;;  %s3726_s27 = smov [#allocation15]  }
  0xab   : > { %p3188_p5 = scmp.ne.s32.totalorder %s4100_s25, %s3187_s20  ;;  %s3191_s12 = sshll.u32 %s3726_s27, 4  ;;  %s3192_s12 = int_to_ptr.vmem [resolvable:$false] %s3191_s12 }
  0xac   : > { %s3193_s16 = scalar_lea.vmem %s3192_s12, 512  ;;  %p3194_p8 = scmp.lt.s32.totalorder %s4100_s25, %s3192_s12 }
  0xad   : > { %p3189_p2 = pnand %p3188_p5, %p3944_p12  ;;  %p3195_p6 = scmp.lt.s32.totalorder %s3193_s16, %s3187_s20 }
  0xaf   : > { %p3190_p1 = pneg %p3189_p2  ;;  %p3196_p0 = por %p3195_p6, %p3194_p8 }
  0xb1   : > { %p3197_p4 = pnand %p3196_p0, %p3190_p1 }
  0xb3   : > { %3200 = shalt.err (!%p3197_p4)
}
  0xb4   : > { %2922 = dma.hbm_to_vmem [thread:$0]  (%p3944_p12), %s4094_s23, 256, %s4100_s25, %s4876_s10, %s4877_s6, %s4877_s6, %s3723_s22  }
  0xb5   : > { %s4133_s28 = scalar_lea.hbm %s4836_s9, %s4098_s14  ;;  %s728_s20 = scalar_lea.vmem [#allocation18], %s3974_s24 }
  0xb6   : > { %s735_s27 = sshll.u32 %s728_s20, 4  ;;  %s726_s12 = scalar_lea.sflag [#allocation19], %s3971_s17  ;;  %s736_s27 = int_to_ptr.vmem [resolvable:$true] %s735_s27 }
  0xb7   : > { %s3201_s16 = scalar_lea.hbm %s4133_s28, 16  ;;  %s3205_s25 = scalar_lea.hbm %s4836_s9, 32 }
  0xb8   : > { %p3202_p11 = scmp.ne.s32.totalorder %s4133_s28, %s3201_s16  ;;  %p3206_p9 = scmp.lt.u32.totalorder %s4133_s28, %s4836_s9 }
  0xb9   : > { %p3207_p13 = scmp.lt.u32.totalorder %s3205_s25, %s3201_s16  ;;  %p3209_p2 = scmp.lt.u32.totalorder %s3201_s16, %s4133_s28 }
  0xba   : > { %p3203_p7 = pnand %p3202_p11, %p3944_p12 }
  0xbb   : > { %p3208_p5 = por %p3207_p13, %p3206_p9 }
  0xbc   : > { %p3204_p10 = pneg %p3203_p7 }
  0xbd   : > { %p3210_p1 = por %p3209_p2, %p3208_p5 }
  0xbf   : > { %p3211_p8 = pnand %p3210_p1, %p3204_p10 }
  0xc1   : > { %3214 = shalt.err (!%p3211_p8)
}
  0xc2   : > { %s3215_s20 = scalar_lea.vmem %s736_s27, 16  ;;  %s3727_s10 = smov [#allocation18]  }
  0xc3   : > { %p3216_p6 = scmp.ne.s32.totalorder %s736_s27, %s3215_s20  ;;  %s3219_s6 = sshll.u32 %s3727_s10, 4  ;;  %s3220_s6 = int_to_ptr.vmem [resolvable:$false] %s3219_s6 }
  0xc4   : > { %s3221_s5 = scalar_lea.vmem %s3220_s6, 32  ;;  %p3222_p11 = scmp.lt.s32.totalorder %s736_s27, %s3220_s6 }
  0xc5   : > { %p3217_p0 = pnand %p3216_p6, %p3944_p12  ;;  %p3223_p7 = scmp.lt.s32.totalorder %s3221_s5, %s3215_s20 }
  0xc7   : > { %p3218_p4 = pneg %p3217_p0  ;;  %p3224_p3 = por %p3223_p7, %p3222_p11 }
  0xc9   : > { %p3225_p9 = pnand %p3224_p3, %p3218_p4 }
  0xcb   : > { %3228 = shalt.err (!%p3225_p9)
}
  0xcc   : > { %2924 = dma.hbm_to_vmem [thread:$0]  (%p3944_p12), %s4133_s28, 16, %s736_s27, %s726_s12  }
  0xcd   : > { %s4160_s10 = scalar_lea.hbm %s4838_s11, %s3980_s21  ;;  %s763_s6 = scalar_lea.vmem [#allocation21], %s3977_s0 }
  0xce   : > { %s770_s25 = sshll.u32 %s763_s6, 4  ;;  %s4881_s3 = scalar_lea.sflag [#allocation22], %s3971_s17  ;;  %s4163_s25 = int_to_ptr.vmem [resolvable:$true] %s770_s25 }
  0xcf   : > { %s3229_s26 = scalar_lea.hbm %s4160_s10, 256  ;;  %s3233_s20 = scalar_lea.hbm %s4838_s11, 512 }
  0xd0   : > { %p3230_p3 = scmp.ne.s32.totalorder %s4160_s10, %s3229_s26  ;;  %p3234_p5 = scmp.lt.u32.totalorder %s4160_s10, %s4838_s11 }
  0xd1   : > { %p3235_p2 = scmp.lt.u32.totalorder %s3233_s20, %s3229_s26  ;;  %p3237_p8 = scmp.lt.u32.totalorder %s3229_s26, %s4160_s10 }
  0xd2   : > { %p3231_p10 = pnand %p3230_p3, %p3944_p12 }
  0xd3   : > { %p3236_p1 = por %p3235_p2, %p3234_p5 }
  0xd4   : > { %p3232_p13 = pneg %p3231_p10 }
  0xd5   : > { %p3238_p6 = por %p3237_p8, %p3236_p1 }
  0xd7   : > { %p3239_p0 = pnand %p3238_p6, %p3232_p13 }
  0xd9   : > { %3242 = shalt.err (!%p3239_p0)
}
  0xda   : > { %s3243_s0 = scalar_lea.vmem %s4163_s25, 256  ;;  %s3728_s16 = smov [#allocation21]  }
  0xdb   : > { %p3244_p4 = scmp.ne.s32.totalorder %s4163_s25, %s3243_s0  ;;  %s3247_s23 = sshll.u32 %s3728_s16, 4  ;;  %s3248_s23 = int_to_ptr.vmem [resolvable:$false] %s3247_s23 }
  0xdc   : > { %s3249_s6 = scalar_lea.vmem %s3248_s23, 512  ;;  %p3250_p9 = scmp.lt.s32.totalorder %s4163_s25, %s3248_s23 }
  0xdd   : > { %p3245_p11 = pnand %p3244_p4, %p3944_p12  ;;  %p3251_p3 = scmp.lt.s32.totalorder %s3249_s6, %s3243_s0 }
  0xdf   : > { %p3246_p7 = pneg %p3245_p11  ;;  %p3252_p10 = por %p3251_p3, %p3250_p9 }
  0xe1   : > { %p3253_p5 = pnand %p3252_p10, %p3246_p7 }
  0xe3   : > { %3256 = shalt.err (!%p3253_p5)
}
  0xe4   : > { %s4924_s26 = smov 64   ;;  %s2677_s28 = sshll.u32 %s3974_s24, 6 }
  0xe5   : > { %2926 = dma.hbm_to_vmem [thread:$0]  (%p3944_p12), %s4160_s10, 256, %s4163_s25, %s4881_s3, %s4924_s26, %s4924_s26, %s3723_s22  }
  0xe6   : > { %s2745_s27 = sshll.u32 %s3711_s18, 10  ;;  %s801_s0 = scalar_lea.vmem [#allocation24], %s2677_s28 }
  0xe7   : > { %s4197_s5 = scalar_lea.hbm %s4840_s13, %s2745_s27  ;;  %s808_s16 = sshll.u32 %s801_s0, 4  ;;  %s4199_s16 = int_to_ptr.vmem [resolvable:$true] %s808_s16 }
  0xe8   : > { %s4880_s23 = scalar_lea.sflag [#allocation25], %s3971_s17  ;;  %s3257_s6 = scalar_lea.hbm %s4197_s5, 1024 }
  0xe9   : > { %p3258_p13 = scmp.ne.s32.totalorder %s4197_s5, %s3257_s6  ;;  %s3261_s20 = scalar_lea.hbm %s4840_s13, 2048 }
  0xea   : > { %p3262_p8 = scmp.lt.u32.totalorder %s4197_s5, %s4840_s13  ;;  %p3263_p6 = scmp.lt.u32.totalorder %s3261_s20, %s3257_s6 }
  0xeb   : > { %p3259_p2 = pnand %p3258_p13, %p3944_p12  ;;  %p3265_p4 = scmp.lt.u32.totalorder %s3257_s6, %s4197_s5 }
  0xec   : > { %p3264_p0 = por %p3263_p6, %p3262_p8 }
  0xed   : > { %p3260_p1 = pneg %p3259_p2 }
  0xee   : > { %p3266_p11 = por %p3265_p4, %p3264_p0 }
  0xf0   : > { %p3267_p7 = pnand %p3266_p11, %p3260_p1 }
  0xf2   : > { %3270 = shalt.err (!%p3267_p7)
}
  0xf3   : > { %s3271_s28 = scalar_lea.vmem %s4199_s16, 1024  ;;  %s3729_s0 = smov [#allocation24]  }
  0xf4   : > { %p3272_p9 = scmp.ne.s32.totalorder %s4199_s16, %s3271_s28  ;;  %s3275_s10 = sshll.u32 %s3729_s0, 4  ;;  %s3276_s10 = int_to_ptr.vmem [resolvable:$false] %s3275_s10 }
  0xf5   : > { %s3277_s25 = scalar_lea.vmem %s3276_s10, 2048  ;;  %p3278_p5 = scmp.lt.s32.totalorder %s4199_s16, %s3276_s10 }
  0xf6   : > { %p3273_p3 = pnand %p3272_p9, %p3944_p12  ;;  %p3279_p13 = scmp.lt.s32.totalorder %s3277_s25, %s3271_s28 }
  0xf8   : > { %p3274_p10 = pneg %p3273_p3  ;;  %p3280_p2 = por %p3279_p13, %p3278_p5 }
  0xfa   : > { %p3281_p8 = pnand %p3280_p2, %p3274_p10 }
  0xfc   : > { %3284 = shalt.err (!%p3281_p8)
}
  0xfd   : > { %2928 = dma.hbm_to_vmem [thread:$0]  (%p3944_p12), %s4197_s5, 1024, %s4199_s16, %s4880_s23, %s4924_s26, %s4924_s26, %s3723_s22  }
  0xfe   : > { %s4232_s27 = scalar_lea.hbm %s4842_s15, %s4098_s14  ;;  %s838_s21 = scalar_lea.vmem [#allocation27], %s3974_s24 }
  0xff   : > { %s845_s28 = sshll.u32 %s838_s21, 4  ;;  %s555_s0 = sand.u32 1, %s3699_s29   ;;  %s4235_s28 = int_to_ptr.vmem [resolvable:$true] %s845_s28 }
 0x100   : > { %s4884_s10 = scalar_lea.sflag [#allocation28], %s3971_s17  ;;  %s3285_s25 = scalar_lea.hbm %s4232_s27, 16 }
 0x101   : > { %p3286_p1 = scmp.ne.s32.totalorder %s4232_s27, %s3285_s25  ;;  %s3289_s5 = scalar_lea.hbm %s4842_s15, 32 }
 0x102   : > { %p3290_p4 = scmp.lt.u32.totalorder %s4232_s27, %s4842_s15  ;;  %p3291_p11 = scmp.lt.u32.totalorder %s3289_s5, %s3285_s25 }
 0x103   : > { %p3287_p6 = pnand %p3286_p1, %p3944_p12  ;;  %p3293_p9 = scmp.lt.u32.totalorder %s3285_s25, %s4232_s27 }
 0x104   : > { %p3292_p7 = por %p3291_p11, %p3290_p4 }
 0x105   : > { %p3288_p0 = pneg %p3287_p6 }
 0x106   : > { %p3294_p3 = por %p3293_p9, %p3292_p7 }
 0x108   : > { %p3295_p10 = pnand %p3294_p3, %p3288_p0 }
 0x10a   : > { %3298 = shalt.err (!%p3295_p10)
}
 0x10b   : > { %s3299_s20 = scalar_lea.vmem %s4235_s28, 16  ;;  %s3730_s21 = smov [#allocation27]  }
 0x10c   : > { %p3300_p5 = scmp.ne.s32.totalorder %s4235_s28, %s3299_s20  ;;  %s3303_s22 = sshll.u32 %s3730_s21, 4  ;;  %s3304_s22 = int_to_ptr.vmem [resolvable:$false] %s3303_s22 }
 0x10d   : > { %s3305_s26 = scalar_lea.vmem %s3304_s22, 32  ;;  %p3306_p8 = scmp.lt.s32.totalorder %s4235_s28, %s3304_s22 }
 0x10e   : > { %p3301_p13 = pnand %p3300_p5, %p3944_p12  ;;  %p3307_p1 = scmp.lt.s32.totalorder %s3305_s26, %s3299_s20 }
 0x110   : > { %p3302_p2 = pneg %p3301_p13  ;;  %p3308_p6 = por %p3307_p1, %p3306_p8 }
 0x112   : > { %p3309_p4 = pnand %p3308_p6, %p3302_p2 }
 0x114   : > { %3312 = shalt.err (!%p3309_p4)
}
 0x115   : > { %2930 = dma.hbm_to_vmem [thread:$0]  (%p3944_p12), %s4232_s27, 16, %s4235_s28, %s4884_s10  }
 0x116   : > { %s2653_s25 = sshll.u32 %s555_s0, 3  ;;  %s2654_s5 = sshll.u32 %s3715_s19, 7 }
 0x117   : > { %s4925_s20 = sld [smem:[#allocation56_spill]]  ;;  %s559_s22 = scalar_lea.vmem [#allocation3], %s2653_s25 }
 0x118   : > { %s566_s26 = sshll.u32 %s559_s22, 4  ;;  %s556_s23 = scalar_lea.sflag [#allocation4], %s555_s0  ;;  %s567_s26 = int_to_ptr.vmem [resolvable:$true] %s566_s26 }
 0x119   : > { %p4926_p11 = scmp.ne.s32.totalorder %s4907_s30, 0 }
 0x11d   : > { %s4268_s21 = scalar_lea.hbm %s4925_s20, %s2654_s5  ;;  %s3317_s16 = scalar_lea.hbm %s4925_s20, 256 }
 0x11e   : > { %s3313_s3 = scalar_lea.hbm %s4268_s21, 128  ;;  %p3318_p3 = scmp.lt.u32.totalorder %s4268_s21, %s4925_s20 }
 0x11f   : > { %p3314_p0 = scmp.ne.s32.totalorder %s4268_s21, %s3313_s3  ;;  %p3319_p10 = scmp.lt.u32.totalorder %s3317_s16, %s3313_s3 }
 0x120   : > { %p3321_p13 = scmp.lt.u32.totalorder %s3313_s3, %s4268_s21 }
 0x121   : > { %p3315_p7 = pnand %p3314_p0, %p4926_p11  ;;  %p3320_p5 = por %p3319_p10, %p3318_p3 }
 0x123   : > { %p3316_p9 = pneg %p3315_p7  ;;  %p3322_p2 = por %p3321_p13, %p3320_p5 }
 0x125   : > { %p3323_p8 = pnand %p3322_p2, %p3316_p9 }
 0x127   : > { %3326 = shalt.err (!%p3323_p8)
}
 0x128   : > { %s3327_s0 = scalar_lea.vmem %s567_s26, 128  ;;  %s3731_s25 = smov [#allocation3]  }
 0x129   : > { %p3328_p1 = scmp.ne.s32.totalorder %s567_s26, %s3327_s0  ;;  %s3331_s22 = sshll.u32 %s3731_s25, 4  ;;  %s3332_s22 = int_to_ptr.vmem [resolvable:$false] %s3331_s22 }
 0x12a   : > { %s3333_s27 = scalar_lea.vmem %s3332_s22, 256  ;;  %p3334_p0 = scmp.lt.s32.totalorder %s567_s26, %s3332_s22 }
 0x12b   : > { %p3329_p6 = pnand %p3328_p1, %p4926_p11  ;;  %p3335_p7 = scmp.lt.s32.totalorder %s3333_s27, %s3327_s0 }
 0x12d   : > { %p3330_p4 = pneg %p3329_p6  ;;  %p3336_p12 = por %p3335_p7, %p3334_p0 }
 0x12f   : > { %p3337_p3 = pnand %p3336_p12, %p3330_p4 }
 0x131   : > { %3340 = shalt.err (!%p3337_p3)
}
 0x132   : > { %2915 = dma.hbm_to_vmem [thread:$0]  (%p4926_p11), %s4268_s21, 128, %s567_s26, %s556_s23  }
 0x133   : > { %s4927_s2 = sld [smem:[#allocation58_spill]]  ;;  %s597_s5 = scalar_lea.vmem [#allocation8], %s3974_s24 }
 0x134   : > { %s604_s6 = sshll.u32 %s597_s5, 4  ;;  %p4928_p9 = scmp.ne.s32.totalorder %s4913_s8, 0  ;;  %s605_s6 = int_to_ptr.vmem [resolvable:$true] %s604_s6 }
 0x139   : > { %s4293_s16 = scalar_lea.hbm %s4927_s2, %s4098_s14  ;;  %s3345_s23 = scalar_lea.hbm %s4927_s2, 32 }
 0x13a   : > { %s3341_s0 = scalar_lea.hbm %s4293_s16, 16  ;;  %p3346_p11 = scmp.lt.u32.totalorder %s4293_s16, %s4927_s2 }
 0x13b   : > { %p3342_p12 = scmp.ne.s32.totalorder %s4293_s16, %s3341_s0  ;;  %p3347_p13 = scmp.lt.u32.totalorder %s3345_s23, %s3341_s0 }
 0x13c   : > { %p3349_p8 = scmp.lt.u32.totalorder %s3341_s0, %s4293_s16 }
 0x13d   : > { %p3343_p10 = pnand %p3342_p12, %p4928_p9  ;;  %p3348_p2 = por %p3347_p13, %p3346_p11 }
 0x13f   : > { %p3344_p5 = pneg %p3343_p10  ;;  %p3350_p1 = por %p3349_p8, %p3348_p2 }
 0x141   : > { %p3351_p6 = pnand %p3350_p1, %p3344_p5 }
 0x143   : > { %3354 = shalt.err (!%p3351_p6)
}
 0x144   : > { %s3355_s22 = scalar_lea.vmem %s605_s6, 16  ;;  %s3732_s27 = smov [#allocation8]  }
 0x145   : > { %p3356_p4 = scmp.ne.s32.totalorder %s605_s6, %s3355_s22  ;;  %s3359_s3 = sshll.u32 %s3732_s27, 4  ;;  %s3360_s3 = int_to_ptr.vmem [resolvable:$false] %s3359_s3 }
 0x146   : > { %s3361_s28 = scalar_lea.vmem %s3360_s3, 32  ;;  %p3362_p3 = scmp.lt.s32.totalorder %s605_s6, %s3360_s3 }
 0x147   : > { %p3357_p0 = pnand %p3356_p4, %p4928_p9  ;;  %p3363_p12 = scmp.lt.s32.totalorder %s3361_s28, %s3355_s22 }
 0x149   : > { %p3358_p7 = pneg %p3357_p0  ;;  %p3364_p10 = por %p3363_p12, %p3362_p3 }
 0x14b   : > { %p3365_p11 = pnand %p3364_p10, %p3358_p7 }
 0x14d   : > { %3368 = shalt.err (!%p3365_p11)
}
 0x14e   : > { %s4929_s5 = scalar_lea.sflag [#allocation7], %s3971_s17  ;;  %s4930_s4 = sld [smem:[#allocation60_spill]] }
 0x14f   : > { %2917 = dma.hbm_to_vmem [thread:$0]  (%p4928_p9), %s4293_s16, 16, %s605_s6, %s4929_s5  }
 0x150   : > { %s635_s23 = scalar_lea.vmem [#allocation11], %s3974_s24 }
 0x151   : > { %s642_s21 = sshll.u32 %s635_s23, 4  ;;  %s643_s21 = int_to_ptr.vmem [resolvable:$true] %s642_s21 }
 0x154   : > { %s4319_s25 = scalar_lea.hbm %s4930_s4, %s4098_s14  ;;  %s3373_s16 = scalar_lea.hbm %s4930_s4, 32 }
 0x155   : > { %s3369_s26 = scalar_lea.hbm %s4319_s25, 16  ;;  %p3374_p8 = scmp.lt.u32.totalorder %s4319_s25, %s4930_s4 }
 0x156   : > { %p3370_p5 = scmp.ne.s32.totalorder %s4319_s25, %s3369_s26  ;;  %p3375_p1 = scmp.lt.u32.totalorder %s3373_s16, %s3369_s26 }
 0x157   : > { %p3377_p4 = scmp.lt.u32.totalorder %s3369_s26, %s4319_s25 }
 0x158   : > { %p3371_p13 = pnand %p3370_p5, %p4928_p9  ;;  %p3376_p6 = por %p3375_p1, %p3374_p8 }
 0x15a   : > { %p3372_p2 = pneg %p3371_p13  ;;  %p3378_p0 = por %p3377_p4, %p3376_p6 }
 0x15c   : > { %p3379_p7 = pnand %p3378_p0, %p3372_p2 }
 0x15e   : > { %3382 = shalt.err (!%p3379_p7)
}
 0x15f   : > { %s3383_s28 = scalar_lea.vmem %s643_s21, 16  ;;  %s3733_s5 = smov [#allocation11]  }
 0x160   : > { %p3384_p3 = scmp.ne.s32.totalorder %s643_s21, %s3383_s28  ;;  %s3387_s0 = sshll.u32 %s3733_s5, 4  ;;  %s3388_s0 = int_to_ptr.vmem [resolvable:$false] %s3387_s0 }
 0x161   : > { %s3389_s30 = scalar_lea.vmem %s3388_s0, 32  ;;  %p3390_p11 = scmp.lt.s32.totalorder %s643_s21, %s3388_s0 }
 0x162   : > { %p3385_p12 = pnand %p3384_p3, %p4928_p9  ;;  %p3391_p5 = scmp.lt.s32.totalorder %s3389_s30, %s3383_s28 }
 0x164   : > { %p3386_p10 = pneg %p3385_p12  ;;  %p3392_p13 = por %p3391_p5, %p3390_p11 }
 0x166   : > { %p3393_p1 = pnand %p3392_p13, %p3386_p10 }
 0x168   : > { %3396 = shalt.err (!%p3393_p1)
}
 0x169   : > { %s4931_s23 = scalar_lea.sflag [#allocation10], %s3971_s17  ;;  %s4932_s27 = sld [smem:[#allocation62_spill]] }
 0x16a   : > { %2919 = dma.hbm_to_vmem [thread:$0]  (%p4928_p9), %s4319_s25, 16, %s643_s21, %s4931_s23  }
 0x16b   : > { %s673_s3 = scalar_lea.vmem [#allocation14], %s3974_s24 }
 0x16c   : > { %s680_s28 = sshll.u32 %s673_s3, 4  ;;  %s681_s28 = int_to_ptr.vmem [resolvable:$true] %s680_s28 }
 0x16f   : > { %s4933_s16 = smov %s4932_s27  ;;  %s4345_s6 = scalar_lea.hbm %s4932_s27, %s4098_s14 }
 0x170   : > { %s3397_s5 = scalar_lea.hbm %s4345_s6, 16  ;;  %s3401_s25 = scalar_lea.hbm %s4933_s16, 32 }
 0x171   : > { %p3398_p2 = scmp.ne.s32.totalorder %s4345_s6, %s3397_s5  ;;  %p3402_p4 = scmp.lt.u32.totalorder %s4345_s6, %s4933_s16 }
 0x172   : > { %p3403_p0 = scmp.lt.u32.totalorder %s3401_s25, %s3397_s5  ;;  %p3405_p3 = scmp.lt.u32.totalorder %s3397_s5, %s4345_s6 }
 0x173   : > { %p3399_p8 = pnand %p3398_p2, %p4928_p9 }
 0x174   : > { %p3404_p7 = por %p3403_p0, %p3402_p4 }
 0x175   : > { %p3400_p6 = pneg %p3399_p8 }
 0x176   : > { %p3406_p12 = por %p3405_p3, %p3404_p7 }
 0x178   : > { %p3407_p10 = pnand %p3406_p12, %p3400_p6 }
 0x17a   : > { %3410 = shalt.err (!%p3407_p10)
}
 0x17b   : > { %s3411_s26 = scalar_lea.vmem %s681_s28, 16  ;;  %s3734_s22 = smov [#allocation14]  }
 0x17c   : > { %p3412_p11 = scmp.ne.s32.totalorder %s681_s28, %s3411_s26  ;;  %s3415_s27 = sshll.u32 %s3734_s22, 4  ;;  %s3416_s27 = int_to_ptr.vmem [resolvable:$false] %s3415_s27 }
 0x17d   : > { %s3417_s3 = scalar_lea.vmem %s3416_s27, 32  ;;  %p3418_p1 = scmp.lt.s32.totalorder %s681_s28, %s3416_s27 }
 0x17e   : > { %p3413_p5 = pnand %p3412_p11, %p4928_p9  ;;  %p3419_p2 = scmp.lt.s32.totalorder %s3417_s3, %s3411_s26 }
 0x180   : > { %p3414_p13 = pneg %p3413_p5  ;;  %p3420_p8 = por %p3419_p2, %p3418_p1 }
 0x182   : > { %p3421_p0 = pnand %p3420_p8, %p3414_p13 }
 0x184   : > { %3424 = shalt.err (!%p3421_p0)
}
 0x185   : > { %s4934_s5 = scalar_lea.sflag [#allocation13], %s3971_s17  ;;  %s4935_s25 = sld [smem:[#allocation63_spill]] }
 0x186   : > { %2921 = dma.hbm_to_vmem [thread:$0]  (%p4928_p9), %s4345_s6, 16, %s681_s28, %s4934_s5  }
 0x187   : > { %s711_s26 = scalar_lea.vmem [#allocation17], %s3974_s24 }
 0x188   : > { %s718_s22 = sshll.u32 %s711_s26, 4  ;;  %s719_s22 = int_to_ptr.vmem [resolvable:$true] %s718_s22 }
 0x18b   : > { %s4936_s21 = smov %s4935_s25  ;;  %s4371_s23 = scalar_lea.hbm %s4935_s25, %s4098_s14 }
 0x18c   : > { %s3425_s27 = scalar_lea.hbm %s4371_s23, 16  ;;  %s3429_s6 = scalar_lea.hbm %s4936_s21, 32 }
 0x18d   : > { %p3426_p6 = scmp.ne.s32.totalorder %s4371_s23, %s3425_s27  ;;  %p3430_p3 = scmp.lt.u32.totalorder %s4371_s23, %s4936_s21 }
 0x18e   : > { %p3431_p12 = scmp.lt.u32.totalorder %s3429_s6, %s3425_s27  ;;  %p3433_p11 = scmp.lt.u32.totalorder %s3425_s27, %s4371_s23 }
 0x18f   : > { %p3427_p4 = pnand %p3426_p6, %p4928_p9 }
 0x190   : > { %p3432_p10 = por %p3431_p12, %p3430_p3 }
 0x191   : > { %p3428_p7 = pneg %p3427_p4 }
 0x192   : > { %p3434_p5 = por %p3433_p11, %p3432_p10 }
 0x194   : > { %p3435_p13 = pnand %p3434_p5, %p3428_p7 }
 0x196   : > { %3438 = shalt.err (!%p3435_p13)
}
 0x197   : > { %s3439_s0 = scalar_lea.vmem %s719_s22, 16  ;;  %s3735_s30 = smov [#allocation17]  }
 0x198   : > { %p3440_p1 = scmp.ne.s32.totalorder %s719_s22, %s3439_s0  ;;  %s3443_s25 = sshll.u32 %s3735_s30, 4  ;;  %s3444_s25 = int_to_ptr.vmem [resolvable:$false] %s3443_s25 }
 0x199   : > { %s3445_s10 = scalar_lea.vmem %s3444_s25, 32  ;;  %p3446_p0 = scmp.lt.s32.totalorder %s719_s22, %s3444_s25 }
 0x19a   : > { %p3441_p2 = pnand %p3440_p1, %p4928_p9  ;;  %p3447_p6 = scmp.lt.s32.totalorder %s3445_s10, %s3439_s0 }
 0x19c   : > { %p3442_p8 = pneg %p3441_p2  ;;  %p3448_p4 = por %p3447_p6, %p3446_p0 }
 0x19e   : > { %p3449_p3 = pnand %p3448_p4, %p3442_p8 }
 0x1a0   : > { %3452 = shalt.err (!%p3449_p3)
}
 0x1a1   : > { %s4937_s26 = scalar_lea.sflag [#allocation16], %s3971_s17  ;;  %s4938_s6 = sld [smem:[#allocation64_spill]] }
 0x1a2   : > { %2923 = dma.hbm_to_vmem [thread:$0]  (%p4928_p9), %s4371_s23, 16, %s719_s22, %s4937_s26  }
 0x1a3   : > { %s745_s5 = scalar_lea.vmem [#allocation20], %s3974_s24 }
 0x1a4   : > { %s752_s0 = sshll.u32 %s745_s5, 4  ;;  %s753_s0 = int_to_ptr.vmem [resolvable:$true] %s752_s0 }
 0x1a7   : > { %s4397_s28 = scalar_lea.hbm %s4938_s6, %s4098_s14  ;;  %s3457_s23 = scalar_lea.hbm %s4938_s6, 32 }
 0x1a8   : > { %s3453_s30 = scalar_lea.hbm %s4397_s28, 16  ;;  %p3458_p11 = scmp.lt.u32.totalorder %s4397_s28, %s4938_s6 }
 0x1a9   : > { %p3454_p7 = scmp.ne.s32.totalorder %s4397_s28, %s3453_s30  ;;  %p3459_p5 = scmp.lt.u32.totalorder %s3457_s23, %s3453_s30 }
 0x1aa   : > { %p3461_p1 = scmp.lt.u32.totalorder %s3453_s30, %s4397_s28 }
 0x1ab   : > { %p3455_p12 = pnand %p3454_p7, %p4928_p9  ;;  %p3460_p13 = por %p3459_p5, %p3458_p11 }
 0x1ad   : > { %p3456_p10 = pneg %p3455_p12  ;;  %p3462_p2 = por %p3461_p1, %p3460_p13 }
 0x1af   : > { %p3463_p8 = pnand %p3462_p2, %p3456_p10 }
 0x1b1   : > { %3466 = shalt.err (!%p3463_p8)
}
 0x1b2   : > { %s3467_s27 = scalar_lea.vmem %s753_s0, 16  ;;  %s3736_s3 = smov [#allocation20]  }
 0x1b3   : > { %p3468_p0 = scmp.ne.s32.totalorder %s753_s0, %s3467_s27  ;;  %s3471_s5 = sshll.u32 %s3736_s3, 4  ;;  %s3472_s5 = int_to_ptr.vmem [resolvable:$false] %s3471_s5 }
 0x1b4   : > { %s3473_s25 = scalar_lea.vmem %s3472_s5, 32  ;;  %p3474_p3 = scmp.lt.s32.totalorder %s753_s0, %s3472_s5 }
 0x1b5   : > { %p3469_p6 = pnand %p3468_p0, %p4928_p9  ;;  %p3475_p7 = scmp.lt.s32.totalorder %s3473_s25, %s3467_s27 }
 0x1b7   : > { %p3470_p4 = pneg %p3469_p6  ;;  %p3476_p12 = por %p3475_p7, %p3474_p3 }
 0x1b9   : > { %p3477_p5 = pnand %p3476_p12, %p3470_p4 }
 0x1bb   : > { %3480 = shalt.err (!%p3477_p5)
}
 0x1bc   : > { %2925 = dma.hbm_to_vmem [thread:$0]  (%p4928_p9), %s4397_s28, 16, %s753_s0, %s726_s12  }
 0x1bd   : > { %s4939_s23 = sld [smem:[#allocation65_spill]]  ;;  %s783_s26 = scalar_lea.vmem [#allocation23], %s3974_s24 }
 0x1be   : > { %s790_s27 = sshll.u32 %s783_s26, 4  ;;  %s791_s27 = int_to_ptr.vmem [resolvable:$true] %s790_s27 }
 0x1c3   : > { %s4423_s22 = scalar_lea.hbm %s4939_s23, %s4098_s14  ;;  %s3485_s12 = scalar_lea.hbm %s4939_s23, 32 }
 0x1c4   : > { %s3481_s3 = scalar_lea.hbm %s4423_s22, 16  ;;  %p3486_p1 = scmp.lt.u32.totalorder %s4423_s22, %s4939_s23 }
 0x1c5   : > { %p3482_p10 = scmp.ne.s32.totalorder %s4423_s22, %s3481_s3  ;;  %p3487_p2 = scmp.lt.u32.totalorder %s3485_s12, %s3481_s3 }
 0x1c6   : > { %p3489_p0 = scmp.lt.u32.totalorder %s3481_s3, %s4423_s22 }
 0x1c7   : > { %p3483_p11 = pnand %p3482_p10, %p4928_p9  ;;  %p3488_p8 = por %p3487_p2, %p3486_p1 }
 0x1c9   : > { %p3484_p13 = pneg %p3483_p11  ;;  %p3490_p6 = por %p3489_p0, %p3488_p8 }
 0x1cb   : > { %p3491_p4 = pnand %p3490_p6, %p3484_p13 }
 0x1cd   : > { %3494 = shalt.err (!%p3491_p4)
}
 0x1ce   : > { %s3495_s30 = scalar_lea.vmem %s791_s27, 16  ;;  %s3737_s10 = smov [#allocation23]  }
 0x1cf   : > { %p3496_p3 = scmp.ne.s32.totalorder %s791_s27, %s3495_s30  ;;  %s3499_s26 = sshll.u32 %s3737_s10, 4  ;;  %s3500_s26 = int_to_ptr.vmem [resolvable:$false] %s3499_s26 }
 0x1d0   : > { %s3501_s5 = scalar_lea.vmem %s3500_s26, 32  ;;  %p3502_p5 = scmp.lt.s32.totalorder %s791_s27, %s3500_s26 }
 0x1d1   : > { %p3497_p7 = pnand %p3496_p3, %p4928_p9  ;;  %p3503_p10 = scmp.lt.s32.totalorder %s3501_s5, %s3495_s30 }
 0x1d3   : > { %p3498_p12 = pneg %p3497_p7  ;;  %p3504_p11 = por %p3503_p10, %p3502_p5 }
 0x1d5   : > { %p3505_p1 = pnand %p3504_p11, %p3498_p12 }
 0x1d7   : > { %3508 = shalt.err (!%p3505_p1)
}
 0x1d8   : > { %s4940_s3 = scalar_lea.sflag [#allocation22], %s3971_s17  ;;  %s4941_s28 = sld [smem:[#allocation66_spill]] }
 0x1d9   : > { %2927 = dma.hbm_to_vmem [thread:$0]  (%p4928_p9), %s4423_s22, 16, %s791_s27, %s4940_s3  }
 0x1da   : > { %s821_s30 = scalar_lea.vmem [#allocation26], %s3974_s24 }
 0x1db   : > { %s828_s10 = sshll.u32 %s821_s30, 4  ;;  %s829_s10 = int_to_ptr.vmem [resolvable:$true] %s828_s10 }
 0x1de   : > { %s4942_s2 = smov %s4941_s28  ;;  %s4449_s0 = scalar_lea.hbm %s4941_s28, %s4098_s14 }
 0x1df   : > { %s3509_s26 = scalar_lea.hbm %s4449_s0, 16  ;;  %s3513_s22 = scalar_lea.hbm %s4942_s2, 32 }
 0x1e0   : > { %p3510_p13 = scmp.ne.s32.totalorder %s4449_s0, %s3509_s26  ;;  %p3514_p0 = scmp.lt.u32.totalorder %s4449_s0, %s4942_s2 }
 0x1e1   : > { %p3515_p6 = scmp.lt.u32.totalorder %s3513_s22, %s3509_s26  ;;  %p3517_p3 = scmp.lt.u32.totalorder %s3509_s26, %s4449_s0 }
 0x1e2   : > { %p3511_p2 = pnand %p3510_p13, %p4928_p9 }
 0x1e3   : > { %p3516_p4 = por %p3515_p6, %p3514_p0 }
 0x1e4   : > { %p3512_p8 = pneg %p3511_p2 }
 0x1e5   : > { %p3518_p7 = por %p3517_p3, %p3516_p4 }
 0x1e7   : > { %p3519_p12 = pnand %p3518_p7, %p3512_p8 }
 0x1e9   : > { %3522 = shalt.err (!%p3519_p12)
}
 0x1ea   : > { %s3523_s25 = scalar_lea.vmem %s829_s10, 16  ;;  %s3738_s12 = smov [#allocation26]  }
 0x1eb   : > { %p3524_p5 = scmp.ne.s32.totalorder %s829_s10, %s3523_s25  ;;  %s3527_s28 = sshll.u32 %s3738_s12, 4  ;;  %s3528_s28 = int_to_ptr.vmem [resolvable:$false] %s3527_s28 }
 0x1ec   : > { %s3529_s4 = scalar_lea.vmem %s3528_s28, 32  ;;  %p3530_p1 = scmp.lt.s32.totalorder %s829_s10, %s3528_s28 }
 0x1ed   : > { %p3525_p10 = pnand %p3524_p5, %p4928_p9  ;;  %p3531_p13 = scmp.lt.s32.totalorder %s3529_s4, %s3523_s25 }
 0x1ef   : > { %p3526_p11 = pneg %p3525_p10  ;;  %p3532_p2 = por %p3531_p13, %p3530_p1 }
 0x1f1   : > { %p3533_p0 = pnand %p3532_p2, %p3526_p11 }
 0x1f3   : > { %3536 = shalt.err (!%p3533_p0)
}
 0x1f4   : > { %s4943_s30 = scalar_lea.sflag [#allocation25], %s3971_s17  ;;  %s4944_s22 = sld [smem:[#allocation67_spill]] }
 0x1f5   : > { %2929 = dma.hbm_to_vmem [thread:$0]  (%p4928_p9), %s4449_s0, 16, %s829_s10, %s4943_s30  }
 0x1f6   : > { %s855_s3 = scalar_lea.vmem [#allocation29], %s3974_s24 }
 0x1f7   : > { %s862_s25 = sshll.u32 %s855_s3, 4  ;;  %s863_s25 = int_to_ptr.vmem [resolvable:$true] %s862_s25 }
 0x1fa   : > { %s4475_s27 = scalar_lea.hbm %s4944_s22, %s4098_s14  ;;  %s3541_s0 = scalar_lea.hbm %s4944_s22, 32 }
 0x1fb   : > { %s3537_s12 = scalar_lea.hbm %s4475_s27, 16  ;;  %p3542_p3 = scmp.lt.u32.totalorder %s4475_s27, %s4944_s22 }
 0x1fc   : > { %p3538_p8 = scmp.ne.s32.totalorder %s4475_s27, %s3537_s12  ;;  %p3543_p7 = scmp.lt.u32.totalorder %s3541_s0, %s3537_s12 }
 0x1fd   : > { %p3545_p5 = scmp.lt.u32.totalorder %s3537_s12, %s4475_s27 }
 0x1fe   : > { %p3539_p6 = pnand %p3538_p8, %p4928_p9  ;;  %p3544_p12 = por %p3543_p7, %p3542_p3 }
 0x200   : > { %p3540_p4 = pneg %p3539_p6  ;;  %p3546_p10 = por %p3545_p5, %p3544_p12 }
 0x202   : > { %p3547_p11 = pnand %p3546_p10, %p3540_p4 }
 0x204   : > { %3550 = shalt.err (!%p3547_p11)
}
 0x205   : > { %s3551_s24 = scalar_lea.vmem %s863_s25, 16  ;;  %s3739_s14 = smov [#allocation29]  }
 0x206   : > { %p3552_p1 = scmp.ne.s32.totalorder %s863_s25, %s3551_s24  ;;  %s3555_s26 = sshll.u32 %s3739_s14, 4  ;;  %s3556_s26 = int_to_ptr.vmem [resolvable:$false] %s3555_s26 }
 0x207   : > { %s3557_s5 = scalar_lea.vmem %s3556_s26, 32  ;;  %p3558_p0 = scmp.lt.s32.totalorder %s863_s25, %s3556_s26 }
 0x208   : > { %p3553_p13 = pnand %p3552_p1, %p4928_p9  ;;  %p3559_p8 = scmp.lt.s32.totalorder %s3557_s5, %s3551_s24 }
 0x20a   : > { %p3554_p2 = pneg %p3553_p13  ;;  %p3560_p6 = por %p3559_p8, %p3558_p0 }
 0x20c   : > { %p3561_p3 = pnand %p3560_p6, %p3554_p2 }
 0x20e   : > { %3564 = shalt.err (!%p3561_p3)
}
 0x20f   : > { %s4945_s3 = scalar_lea.sflag [#allocation28], %s3971_s17 }
 0x210   : > { %2931 = dma.hbm_to_vmem [thread:$0]  (%p4928_p9), %s4475_s27, 16, %s863_s25, %s4945_s3  }
 0x211 PF: > { %p2683_p4 = scmp.ge.s32.totalorder %s3719_s1, 1  ;;  %p867_p7 = scmp.lt.s32.totalorder %s3719_s1, 5 }
 0x213   : > { %p868_p12 = pnand %p2683_p4, %p867_p7 }
 0x214   : > { %s4946_s12 = sld [smem:[#allocation44_spill]] (!%p868_p12)  ;;  %s4947_s28 = sld [smem:[#allocation50_spill]] (!%p868_p12) }
 0x215   : > { %871 = sbr.rel (%p868_p12) target bundleno = 3023 (0xbcf), region = 88 }
 0x21a   : > { %s4500_s4 = sand.u32 (!%p868_p12), 1, %s4946_s12   ;;  %p4948_p9 = scmp.ne.s32.totalorder (!%p868_p12), %s4947_s28, 0 }
 0x21b   : > { %s2684_s0 = sshll.u32 (!%p868_p12), %s4500_s4, 3  ;;  %s874_s8 = scalar_lea.sflag (!%p868_p12), [#allocation4], %s4500_s4 }
 0x21c   : > { %s4506_s17 = scalar_lea.vmem [#allocation3], %s2684_s0 }
 0x21d   : > { %3638 = dma.done.wait (%p4948_p9), %s874_s8, 128  }
 0x21e   : > { %3640 = vsyncadd (%p4948_p9), %s874_s8, 4294967168  ;;  %s4949_s27 = sld [smem:[#allocation47_spill]]  ;;  %s4950_s25 = sld [smem:[#allocation41_spill]] }
 0x21f   : > { %s4951_s10 = sld [smem:[#allocation53_spill]] }
 0x224   : > { %s4513_s30 = sand.u32 1, %s4949_s27   ;;  %s4516_s24 = sand.u32 1, %s4950_s25  }
 0x225   : > { %s4519_s14 = sshll.u32 %s4516_s24, 4  ;;  %s883_s26 = scalar_lea.sflag [#allocation7], %s4513_s30 }
 0x226   : > { %p4952_p5 = scmp.ne.s32.totalorder %s4951_s10, 0 }
 0x228   : > { %3642 = dma.done.wait (%p4952_p5), %s883_s26, 272  }
 0x229   : > { %3644 = vsyncadd (%p4952_p5), %s883_s26, 4294967024  ;;  %s900_s12 = scalar_lea.sflag [#allocation10], %s4513_s30 }
 0x22a   : > { %3646 = dma.done.wait (%p4952_p5), %s900_s12, 272  }
 0x22b   : > { %3648 = vsyncadd (%p4952_p5), %s900_s12, 4294967024  ;;  %s917_s27 = scalar_lea.sflag [#allocation13], %s4513_s30 }
 0x22c   : > { %3650 = dma.done.wait (%p4952_p5), %s917_s27, 272  }
 0x22d   : > { %3652 = vsyncadd (%p4952_p5), %s917_s27, 4294967024  ;;  %s934_s3 = scalar_lea.sflag [#allocation16], %s4513_s30  ;;  %s4544_s28 = scalar_lea.vmem [#allocation15], %s4519_s14 }
 0x22e   : > { %3654 = dma.done.wait (%p4952_p5), %s934_s3, 272  }
 0x22f   : > { %3656 = vsyncadd (%p4952_p5), %s934_s3, 4294967024  ;;  %s951_s8 = scalar_lea.sflag [#allocation19], %s4513_s30 }
 0x230   : > { %3658 = dma.done.wait (%p4952_p5), %s951_s8, 32  }
 0x231   : > { %3660 = vsyncadd (%p4952_p5), %s951_s8, 4294967264  ;;  %s967_s25 = scalar_lea.sflag [#allocation22], %s4513_s30 }
 0x232   : > { %3662 = dma.done.wait (%p4952_p5), %s967_s25, 272  }
 0x233   : > { %3664 = vsyncadd (%p4952_p5), %s967_s25, 4294967024  ;;  %s2690_s3 = sshll.u32 %s4516_s24, 6  ;;  %s984_s12 = scalar_lea.sflag [#allocation25], %s4513_s30 }
 0x234   : > { %s4567_s8 = scalar_lea.vmem [#allocation24], %s2690_s3 }
 0x235   : > { %3666 = dma.done.wait (%p4952_p5), %s984_s12, 1040  }
 0x236   : > { %3668 = vsyncadd (%p4952_p5), %s984_s12, 4294966256  ;;  %s995_s26 = scalar_lea.vmem [#allocation26], %s4516_s24  ;;  %s1001_s25 = scalar_lea.sflag [#allocation28], %s4513_s30 }
 0x237   : > { %s1003_s5 = scalar_lea.vmem [#allocation27], %s4516_s24 }
 0x238   : > { %3670 = dma.done.wait (%p4952_p5), %s1001_s25, 32  }
 0x239   : > { %3672 = vsyncadd (%p4952_p5), %s1001_s25, 4294967264  ;;  %s1011_s3 = scalar_lea.vmem [#allocation29], %s4516_s24  ;;  %s4583_s27 = scalar_lea.vmem [#allocation30], %s2684_s0 }
 0x23a   : > { %s4953_s2 = sld [smem:[#allocation45_spill]] }
 0x240   : > { %p2692_p10 = scmp.ne.s32.totalorder %s4953_s2, 0 }
 0x241   : > { %v1137_v0 = vld [vmem:[%s4506_s17] sm:$0xff] (!%p2692_p10)  ;;  %vm1138_vm0 = vcmask (!%p2692_p10), 261120  }
 0x242   : > { %1136 = sbr.rel (%p2692_p10) target bundleno = 585 (0x249), region = 160  ;;  %1139 = vst.msk [vmem:[#allocation2] sm:$0xff] (!%p2692_p10), %vm1138_vm0, %v1137_v0 }
 0x249 PF: > { %s4954_s30 = scalar_lea.vmem [#allocation6], %s4519_s14  ;;  %v3740_v2 = vmov 0.0   ;;  %vm3741_vm1 = vmmov 0   ;;  %v4595_v4 = vld [vmem:[#allocation2] sm:$0xff]  ;;  %vm1165_vm2 = vcmask 261120   ;;  %s4956_s2 = scalar_lea.vmem [#allocation9], %s4519_s14 }
 0x24a   : > { %v3051_v1 = vld [vmem:[%s4954_s30] sm:$0xff]   ;;  %2791 = vmatprep.subr.bf16.mxu1 %v3740_v2  ;;  %s4955_s10 = smov %s4954_s30  ;;  %2821 = vmatprep.subr.bf16.mxu0 %v3740_v2  ;;  %v1141_v6 = vpack.c.bf16 %v4595_v4, %v4595_v4  ;;  %s4957_s0 = smov %s4956_s2  ;;  %vm1360_vm3 = vcmask 64512   ;;  %vm1596_vm4 = vcmask 1043456  }
 0x24b   : > { %v3052_v3 = vld [vmem:[%s4955_s10 + $0x8] sm:$0xff]   ;;  %2792 = vmatpush3.bf16.msra.mxu1 %v3051_v1  ;;  %2795 = vmatprep.mubr.msk.bf16.mxu1 %vm3741_vm1, %v3740_v2  ;;  %s4958_s17 = scalar_lea.vmem [#allocation12], %s4519_s14  ;;  %s4960_s25 = scalar_lea.vmem [#allocation8], %s4516_s24 }
 0x24c   : > { %2793 = vmatprep.subr.bf16.mxu1 %v3740_v2  ;;  %2823 = vmatprep.mubr.msk.bf16.mxu0 %vm3741_vm1, %v3740_v2  ;;  %v3053_v5 = vld [vmem:[%s4956_s2] sm:$0xff]   ;;  %s4959_s12 = smov %s4958_s17  ;;  %s4961_s30 = scalar_lea.vmem [#allocation11], %s4516_s24 }
 0x24d   : > { %v3054_v7 = vld [vmem:[%s4957_s0 + $0x8] sm:$0xff]   ;;  %v2693_v10 = vld [vmem:[%s4960_s25] ss:$0 sm:$0xff]  ;;  %s3742_s10 = smov 120   ;;  %s3743_s2 = smov 104  }
 0x24e   : > { %v3055_v8 = vld [vmem:[%s4958_s17] sm:$0xff]   ;;  %s3744_s0 = smov 112   ;;  %s4962_s17 = scalar_lea.vmem [#allocation14], %s4516_s24 }
 0x24f   : > { %2794 = vmatpush3.bf16.msra.mxu1 %v3052_v3  ;;  %v3056_v9 = vld [vmem:[%s4959_s12 + $0x8] sm:$0xff]   ;;  %v2697_v18 = vld [vmem:[%s4961_s30] ss:$0 sm:$0xff]  ;;  %s4964_s12 = scalar_lea.vmem [#allocation21], %s4519_s14  ;;  %s4966_s30 = scalar_lea.vmem [#allocation18], %s4516_s24 }
 0x250   : > { %2799 = vmatprep.subr.bf16.mxu1 %v3740_v2  ;;  %v2701_v31 = vld [vmem:[%s4962_s17] ss:$0 sm:$0xff]  ;;  %s4965_s25 = smov %s4964_s12  ;;  %s4967_s14 = scalar_lea.vmem [#allocation20], %s4516_s24 }
 0x252   : > { %2796 = vmatmul.mubr.msk.bf16.vlgmr.msra.gmra.mrb[0].mxu1 %vm1165_vm2, %v1141_v6 }
 0x253   : > { %2800 = vmatpush3.bf16.msra.mxu1 %v3053_v5  ;;  %2803 = vmatprep.mubr.msk.bf16.mxu1 %vm3741_vm1, %v3740_v2 }
 0x254   : > { %2801 = vmatprep.subr.bf16.mxu1 %v3740_v2 }
 0x257   : > { %2802 = vmatpush3.bf16.msra.mxu1 %v3054_v7 }
 0x258   : > { %2807 = vmatprep.subr.bf16.mxu1 %v3740_v2 }
 0x25a   : > { %2804 = vmatmul.mubr.msk.bf16.vlgmr.msra.gmra.mrb[4].mxu1 %vm1165_vm2, %v1141_v6 }
 0x25b   : > { %2811 = vmatprep.mubr.msk.bf16.mxu1 %vm3741_vm1, %v3740_v2  ;;  %2808 = vmatpush3.bf16.msra.mxu1 %v3055_v8 }
 0x25c   : > { %2809 = vmatprep.subr.bf16.mxu1 %v3740_v2 }
 0x25f   : > { %2810 = vmatpush3.bf16.msra.mxu1 %v3056_v9 }
 0x260   : > { %2815 = vmatprep.subr.bf16.mxu1 %v3740_v2 }
 0x262   : > { %2812 = vmatmul.mubr.msk.bf16.vlgmr.msra.gmra.mrb[8].mxu1 %vm1165_vm2, %v1141_v6 }
 0x263   : > { %2817 = vmatprep.mubr.msk.bf16.mxu1 %vm3741_vm1, %v3740_v2 }
 0x325   : > { %v1203_v11 = vpop.f32.mrb[0].mxu1 }
 0x326   : > { %v1204_v12 = vadd.f32 %v2693_v10, %v1203_v11  ;;  %v2797_v13 = vpop.f32.mrb[1].mxu1 }
 0x327   : > { %v1206_v14 = vpop.f32.mrb[2].mxu1 }
 0x328   : > { %v1335_v15 = vmul.f32 0.35355338, %v1204_v12  ;;  %v2798_v16 = vpop.f32.mrb[3].mxu1 }
 0x32a   : > { %v1336_v17 = vpack.c.bf16 %v1335_v15, %v1335_v15 }
 0x32c   : > { %1338 = vrot.lane.b32.xlu1 %v1336_v17, %s3742_s10 }
 0x32d   : > { %v1266_v19 = vpop.f32.mrb[4].mxu1 }
 0x32e   : > { %v1267_v20 = vadd.f32 %v2697_v18, %v1266_v19  ;;  %v2805_v21 = vpop.f32.mrb[5].mxu1 }
 0x32f   : > { %v1269_v22 = vpop.f32.mrb[6].mxu1 }
 0x330   : > { %v1344_v23 = vpack.c.bf16 %v1267_v20, %v1267_v20  ;;  %v2806_v24 = vpop.f32.mrb[7].mxu1 }
 0x332   : > { %1350 = vrot.lane.b32.xlu1 %v1344_v23, %s3743_s2  ;;  %1346 = vrot.lane.b32.xlu0 %v1344_v23, %s3742_s10  ;;  %v1365_v25 = vsel %vm1360_vm3, %v1344_v23, 0 }
 0x333   : > { %2816 = vmatpush3.bf16.xpose.msra.mxu1 %v1365_v25 }
 0x334   : > { %2827 = vmatprep.subr.bf16.mxu1 %v3740_v2 }
 0x335   : > { %v1329_v26 = vpop.f32.mrb[8].mxu1 }
 0x336   : > { %1342 = vrot.lane.b32.xlu1 %v1336_v17, %s3743_s2  ;;  %1348 = vrot.lane.b32.xlu0 %v1344_v23, %s3744_s0  ;;  %v2813_v27 = vpop.f32.mrb[9].mxu1  ;;  %v1330_v34 = vadd.f32 %v2701_v31, %v1329_v26 }
 0x337   : > { %v1332_v28 = vpop.f32.mrb[10].mxu1 }
 0x338   : > { %v2814_v29 = vpop.f32.mrb[11].mxu1  ;;  %v4644_v38 = vpack.c.bf16 %v1330_v34, %v1330_v34 }
 0x33a   : > { %1340 = vrot.lane.b32.xlu0 %v1336_v17, %s3744_s0  ;;  %2818 = vmatmul.mubr.msk.bf16.vlgmr.msra.gmra.mrb[12].mxu1 %vm1360_vm3, %v1336_v17  ;;  %v1598_v40 = vsel %vm1596_vm4, %v4644_v38, 0 }
 0x33b   : > { %2829 = vmatprep.mubr.msk.bf16.mxu1 %vm3741_vm1, %v3740_v2 }
 0x39e   : > { %v1339_v33 = vpop.permute.xlu1 %1338 }
 0x3a4   : > { %v1347_v30 = vpop.permute.xlu0 %1346  ;;  %v1351_v37 = vpop.permute.xlu1 %1350 }
 0x3a5   : > { %v1411_v32 = vsel %vm1360_vm3, %v1347_v30, 0  ;;  %v1503_v39 = vsel %vm1360_vm3, %v1351_v37, 0  ;;  %v1782_v37 = vld [vmem:[%s4544_s28] sm:$0xf] }
 0x3a6   : > { %2822 = vmatpush3.bf16.xpose.msra.mxu0 %v1411_v32 }
 0x3a7   : > { %2833 = vmatprep.subr.bf16.mxu0 %v3740_v2 }
 0x3a8   : > { %v1349_v35 = vpop.permute.xlu0 %1348  ;;  %v1343_v42 = vpop.permute.xlu1 %1342 }
 0x3a9   : > { %v1457_v36 = vsel %vm1360_vm3, %v1349_v35, 0 }
 0x3aa   : > { %2828 = vmatpush3.bf16.xpose.msra.mxu1 %v1457_v36 }
 0x3ab   : > { %2839 = vmatprep.subr.bf16.mxu1 %v3740_v2 }
 0x3ac   : > { %v1341_v41 = vpop.permute.xlu0 %1340 }
 0x3ad   : > { %2824 = vmatmul.mubr.msk.bf16.vlgmr.msra.gmra.mrb[0].mxu0 %vm1360_vm3, %v1339_v33 }
 0x3ae   : > { %2834 = vmatpush3.bf16.xpose.msra.mxu0 %v1503_v39  ;;  %2835 = vmatprep.mubr.msk.bf16.mxu0 %vm3741_vm1, %v3740_v2 }
 0x3af   : > { %2845 = vmatprep.subr.bf16.mxu0 %v3740_v2 }
 0x3b1   : > { %2830 = vmatmul.mubr.msk.bf16.vlgmr.msra.gmra.mrb[16].mxu1 %vm1360_vm3, %v1341_v41  ;;  %v1790_v41 = vsel %vm1596_vm4, %v1782_v37, 0 }
 0x3b2   : > { %2840 = vmatpush3.bf16.msra.mxu1 %v1598_v40  ;;  %2841 = vmatprep.mubr.msk.bf16.mxu1 %vm3741_vm1, %v3740_v2 }
 0x3b3   : > { %2851 = vmatprep.subr.bf16.mxu1 %v3740_v2 }
 0x3b5   : > { %2836 = vmatmul.mubr.msk.bf16.vlgmr.msra.gmra.mrb[4].mxu0 %vm1360_vm3, %v1343_v42 }
 0x3b6   : > { %2847 = vmatprep.mubr.msk.bf16.mxu0 %vm3741_vm1, %v3740_v2 }
 0x40d   : > { %v1401_v43 = vpop.f32.mrb[12].mxu1 }
 0x40e   : > { %v2819_v44 = vpop.f32.mrb[13].mxu1  ;;  %v1545_v45 = vsel %vm1360_vm3, %v1401_v43, -inf }
 0x40f   : > { %1546 = vmax.xlane.f32.xlu0 %v1545_v45  ;;  %v1404_v46 = vpop.f32.mrb[14].mxu1 }
 0x410   : > { %v2820_v47 = vpop.f32.mrb[15].mxu1 }
 0x411   : > { %v1784_v47 = vld [vmem:[%s4544_s28 + $0x8] sm:$0xf] }
 0x480   : > { %v1447_v48 = vpop.f32.mrb[0].mxu0 }
 0x481   : > { %v2825_v49 = vpop.f32.mrb[1].mxu0  ;;  %v1548_v50 = vsel %vm1360_vm3, %v1447_v48, -inf }
 0x482   : > { %1549 = vmax.xlane.f32.xlu1 %v1548_v50  ;;  %v1450_v51 = vpop.f32.mrb[2].mxu0 }
 0x483   : > { %v2826_v52 = vpop.f32.mrb[3].mxu0  ;;  %v1882_v51 = vsel %vm1596_vm4, %v1784_v47, 0  ;;  %v2718_v47 = vld [vmem:[%s4966_s30] ss:$0 sm:$0xff] }
 0x484   : > { %v1493_v53 = vpop.f32.mrb[16].mxu1 }
 0x485   : > { %v2831_v54 = vpop.f32.mrb[17].mxu1  ;;  %v1551_v55 = vsel %vm1360_vm3, %v1493_v53, -inf }
 0x486   : > { %1552 = vmax.xlane.f32.xlu0 %v1551_v55  ;;  %v1496_v56 = vpop.f32.mrb[18].mxu1  ;;  %v1785_v54 = vld [vmem:[%s4544_s28 + $0xc] sm:$0xf] }
 0x487   : > { %v2832_v57 = vpop.f32.mrb[19].mxu1 }
 0x488   : > { %v1539_v58 = vpop.f32.mrb[4].mxu0 }
 0x489   : > { %v2837_v59 = vpop.f32.mrb[5].mxu0  ;;  %v1554_v60 = vsel %vm1360_vm3, %v1539_v58, -inf }
 0x48a   : > { %v1542_v61 = vpop.f32.mrb[6].mxu0  ;;  %1555 = vmax.xlane.f32.xlu0 %v1554_v60 }
 0x48b   : > { %v2838_v62 = vpop.f32.mrb[7].mxu0 }
 0x493   : > { %1354 = vrot.lane.b32.xlu1 %v4644_v38, %s3742_s10  ;;  %s4968_s10 = scalar_lea.vmem [#allocation23], %s4516_s24 }
 0x49c   : > { %v1547_v63 = vpop.xlane.xlu0 %1546 }
 0x49d   : > { %v1557_v0 = vsub.f32 %v1401_v43, %v1547_v63  ;;  %v1783_v43 = vld [vmem:[%s4544_s28 + $0x4] sm:$0xf]  ;;  %s4963_s28 = scalar_lea.vmem [#allocation17], %s4516_s24 }
 0x49e   : > { %v1836_v46 = vsel %vm1596_vm4, %v1783_v43, 0 }
 0x49f   : > { %v1561_v1 = vmul.f32 1.442695, %v1557_v0 }
 0x4a1   : > { %3067 = vpow2.f32 %v1561_v1 }
 0x4ab   : > { %v3068_v3 = vpop.eup %3067 }
 0x4ac   : > { %v1569_v5 = vsel %vm1360_vm3, %v3068_v3, 0.0 }
 0x4b7   : > { %1570 = vadd.xlane.f32.xlu1 %v1569_v5 }
 0x50f   : > { %v1550_v6 = vpop.xlane.xlu1 %1549 }
 0x510   : > { %v1558_v7 = vsub.f32 %v1447_v48, %v1550_v6 }
 0x512   : > { %v1563_v8 = vmul.f32 1.442695, %v1558_v7 }
 0x513   : > { %v1355_v9 = vpop.permute.xlu1 %1354  ;;  %v1553_v10 = vpop.xlane.xlu0 %1552 }
 0x514   : > { %3069 = vpow2.f32 %v1563_v8  ;;  %v1644_v11 = vsel %vm1596_vm4, %v1355_v9, 0  ;;  %v1559_v12 = vsub.f32 %v1493_v53, %v1553_v10 }
 0x515   : > { %2846 = vmatpush3.bf16.msra.mxu0 %v1644_v11 }
 0x516   : > { %v1565_v13 = vmul.f32 1.442695, %v1559_v12  ;;  %2857 = vmatprep.subr.bf16.mxu0 %v3740_v2 }
 0x517   : > { %v1556_v14 = vpop.xlane.xlu0 %1555 }
 0x518   : > { %3071 = vpow2.f32 %v1565_v13  ;;  %v1560_v15 = vsub.f32 %v1539_v58, %v1556_v14  ;;  %v1928_v58 = vsel %vm1596_vm4, %v1785_v54, 0  ;;  %v3061_v54 = vld [vmem:[%s4567_s8 + $0x10] sm:$0xff]  }
 0x51a   : > { %v1567_v16 = vmul.f32 1.442695, %v1560_v15 }
 0x51c   : > { %3073 = vpow2.f32 %v1567_v16 }
 0x51e   : > { %v3070_v17 = vpop.eup %3069 }
 0x51f   : > { %v1572_v18 = vsel %vm1360_vm3, %v3070_v17, 0.0 }
 0x520   : > { %1573 = vadd.xlane.f32.xlu0 %v1572_v18 }
 0x522   : > { %v3072_v19 = vpop.eup %3071 }
 0x523   : > { %v1575_v20 = vsel %vm1360_vm3, %v3072_v19, 0.0 }
 0x524   : > { %1576 = vadd.xlane.f32.xlu1 %v1575_v20 }
 0x526   : > { %v3074_v21 = vpop.eup %3073 }
 0x527   : > { %v1578_v22 = vsel %vm1360_vm3, %v3074_v21, 0.0 }
 0x528   : > { %1579 = vadd.xlane.f32.xlu0 %v1578_v22 }
 0x535   : > { %1358 = vrot.lane.b32.xlu1 %v4644_v38, %s3743_s2 }
 0x53e   : > { %1356 = vrot.lane.b32.xlu0 %v4644_v38, %s3744_s0 }
 0x544   : > { %v1571_v23 = vpop.xlane.xlu1 %1570 }
 0x545   : > { %3075 = vrcp.f32 %v1571_v23 }
 0x54f   : > { %v3076_v24 = vpop.eup %3075 }
 0x550   : > { %v1585_v25 = vmul.f32 %v3076_v24, %v3068_v3 }
 0x552   : > { %v1589_v26 = vpack.c.bf16 %v1585_v25, %v1585_v25 }
 0x554   : > { %2842 = vmatmul.mubr.msk.bf16.vlgmr.msra.gmra.mrb[20].mxu1 %vm1360_vm3, %v1589_v26 }
 0x555   : > { %2853 = vmatprep.mubr.msk.bf16.mxu1 %vm3741_vm1, %v3740_v2 }
 0x5ad   : > { %v1574_v27 = vpop.xlane.xlu0 %1573 }
 0x5ae   : > { %3077 = vrcp.f32 %v1574_v27 }
 0x5b1   : > { %v1577_v28 = vpop.xlane.xlu1 %1576 }
 0x5b2   : > { %3079 = vrcp.f32 %v1577_v28  ;;  %v2717_v28 = vld [vmem:[%s4963_s28] ss:$0 sm:$0xff] }
 0x5b5   : > { %v1580_v29 = vpop.xlane.xlu0 %1579  ;;  %v1359_v33 = vpop.permute.xlu1 %1358 }
 0x5b6   : > { %3081 = vrcp.f32 %v1580_v29  ;;  %v1736_v39 = vsel %vm1596_vm4, %v1359_v33, 0 }
 0x5b8   : > { %v3078_v30 = vpop.eup %3077 }
 0x5b9   : > { %v1586_v31 = vmul.f32 %v3078_v30, %v3070_v17  ;;  %v1357_v32 = vpop.permute.xlu0 %1356 }
 0x5ba   : > { %v1690_v34 = vsel %vm1596_vm4, %v1357_v32, 0 }
 0x5bb   : > { %2852 = vmatpush3.bf16.msra.mxu1 %v1690_v34  ;;  %v1590_v35 = vpack.c.bf16 %v1586_v31, %v1586_v31 }
 0x5bc   : > { %v3080_v36 = vpop.eup %3079  ;;  %2863 = vmatprep.subr.bf16.mxu1 %v3740_v2 }
 0x5bd   : > { %v1587_v38 = vmul.f32 %v3080_v36, %v3072_v19  ;;  %2848 = vmatmul.mubr.msk.bf16.vlgmr.msra.gmra.mrb[8].mxu0 %vm1360_vm3, %v1590_v35 }
 0x5be   : > { %2858 = vmatpush3.bf16.msra.mxu0 %v1736_v39  ;;  %2859 = vmatprep.mubr.msk.bf16.mxu0 %vm3741_vm1, %v3740_v2 }
 0x5bf   : > { %v1591_v40 = vpack.c.bf16 %v1587_v38, %v1587_v38  ;;  %2869 = vmatprep.subr.bf16.mxu0 %v3740_v2 }
 0x5c0   : > { %v3082_v42 = vpop.eup %3081 }
 0x5c1   : > { %v1588_v44 = vmul.f32 %v3082_v42, %v3074_v21  ;;  %2854 = vmatmul.mubr.msk.bf16.vlgmr.msra.gmra.mrb[24].mxu1 %vm1360_vm3, %v1591_v40  ;;  %v3058_v42 = vld [vmem:[%s4965_s25 + $0x8] sm:$0xff]  }
 0x5c2   : > { %2864 = vmatpush3.bf16.msra.mxu1 %v1790_v41  ;;  %2865 = vmatprep.mubr.msk.bf16.mxu1 %vm3741_vm1, %v3740_v2  ;;  %v3057_v41 = vld [vmem:[%s4964_s12] sm:$0xff]  }
 0x5c3   : > { %v1592_v45 = vpack.c.bf16 %v1588_v44, %v1588_v44  ;;  %2875 = vmatprep.subr.bf16.mxu1 %v3740_v2 }
 0x5c5   : > { %2860 = vmatmul.mubr.msk.bf16.vlgmr.msra.gmra.mrb[12].mxu0 %vm1360_vm3, %v1592_v45 }
 0x5c6   : > { %2870 = vmatpush3.bf16.msra.mxu0 %v1836_v46  ;;  %2871 = vmatprep.mubr.msk.bf16.mxu0 %vm3741_vm1, %v3740_v2 }
 0x5c7   : > { %2881 = vmatprep.subr.bf16.mxu0 %v3740_v2 }
 0x627   : > { %v1634_v48 = vpop.f32.mrb[20].mxu1 }
 0x628   : > { %v1778_v49 = vpack.c.bf16 %v1634_v48, %v1634_v48  ;;  %v2843_v50 = vpop.f32.mrb[21].mxu1 }
 0x629   : > { %v1637_v52 = vpop.f32.mrb[22].mxu1 }
 0x62a   : > { %v2844_v53 = vpop.f32.mrb[23].mxu1  ;;  %2866 = vmatmul.mubr.msk.bf16.vlgmr.msra.gmra.mrb[28].mxu1 %vm1360_vm3, %v1778_v49  ;;  %v2719_v49 = vld [vmem:[%s4967_s14] ss:$0 sm:$0xff] }
 0x62b   : > { %2876 = vmatpush3.bf16.msra.mxu1 %v1882_v51  ;;  %2877 = vmatprep.mubr.msk.bf16.mxu1 %vm3741_vm1, %v3740_v2  ;;  %v3060_v53 = vld [vmem:[%s4567_s8 + $0x8] sm:$0xff]  }
 0x62c   : > { %2887 = vmatprep.subr.bf16.mxu1 %v3740_v2 }
 0x690   : > { %v1680_v55 = vpop.f32.mrb[8].mxu0 }
 0x691   : > { %v1779_v56 = vpack.c.bf16 %v1680_v55, %v1680_v55  ;;  %v2849_v57 = vpop.f32.mrb[9].mxu0  ;;  %v3062_v55 = vld [vmem:[%s4567_s8 + $0x18] sm:$0xff]  }
 0x692   : > { %v1683_v59 = vpop.f32.mrb[10].mxu0  ;;  %v3064_v57 = vld [vmem:[%s4567_s8 + $0x28] sm:$0xff]  }
 0x693   : > { %v2850_v60 = vpop.f32.mrb[11].mxu0  ;;  %2872 = vmatmul.mubr.msk.bf16.vlgmr.msra.gmra.mrb[16].mxu0 %vm1360_vm3, %v1779_v56  ;;  %v3063_v56 = vld [vmem:[%s4567_s8 + $0x20] sm:$0xff]   ;;  %v3066_v59 = vld [vmem:[%s4567_s8 + $0x38] sm:$0xff]  }
 0x694   : > { %v1726_v61 = vpop.f32.mrb[24].mxu1  ;;  %2882 = vmatpush3.bf16.msra.mxu0 %v1928_v58  ;;  %2883 = vmatprep.mubr.msk.bf16.mxu0 %vm3741_vm1, %v3740_v2  ;;  %v3065_v58 = vld [vmem:[%s4567_s8 + $0x30] sm:$0xff]   ;;  %v2720_v60 = vld [vmem:[%s4968_s10] ss:$0 sm:$0xff] }
 0x695   : > { %v1780_v62 = vpack.c.bf16 %v1726_v61, %v1726_v61  ;;  %v2855_v63 = vpop.f32.mrb[25].mxu1  ;;  %2895 = vmatprep.subr.bf16.mxu0 %v3740_v2 }
 0x696   : > { %v1729_v0 = vpop.f32.mrb[26].mxu1 }
 0x697   : > { %v2856_v1 = vpop.f32.mrb[27].mxu1  ;;  %2878 = vmatmul.mubr.msk.bf16.vlgmr.msra.gmra.mrb[32].mxu1 %vm1360_vm3, %v1780_v62 }
 0x698   : > { %v1772_v3 = vpop.f32.mrb[12].mxu0  ;;  %2891 = vmatprep.mubr.msk.bf16.mxu1 %vm3741_vm1, %v3740_v2  ;;  %2888 = vmatpush3.bf16.msra.mxu1 %v3057_v41 }
 0x699   : > { %v1781_v5 = vpack.c.bf16 %v1772_v3, %v1772_v3  ;;  %v2861_v6 = vpop.f32.mrb[13].mxu0  ;;  %2889 = vmatprep.subr.bf16.mxu1 %v3740_v2 }
 0x69a   : > { %v1775_v7 = vpop.f32.mrb[14].mxu0 }
 0x69b   : > { %v2862_v8 = vpop.f32.mrb[15].mxu0  ;;  %2884 = vmatmul.mubr.msk.bf16.vlgmr.msra.gmra.mrb[20].mxu0 %vm1360_vm3, %v1781_v5 }
 0x69c   : > { %2911 = vmatprep.mubr.msk.bf16.mxu0 %vm3741_vm1, %v3740_v2  ;;  %2890 = vmatpush3.bf16.msra.mxu1 %v3058_v42 }
 0x6fd   : > { %v1826_v9 = vpop.f32.mrb[28].mxu1 }
 0x6fe   : > { %v2867_v10 = vpop.f32.mrb[29].mxu1  ;;  %v1970_v14 = vsel %vm1165_vm2, %v1826_v9, 0.0 }
 0x6ff   : > { %v1829_v11 = vpop.f32.mrb[30].mxu1 }
 0x700   : > { %v2868_v12 = vpop.f32.mrb[31].mxu1 }
 0x766   : > { %v1872_v13 = vpop.f32.mrb[16].mxu0 }
 0x767   : > { %v1971_v15 = vsel %vm1165_vm2, %v1872_v13, 0.0  ;;  %v2873_v16 = vpop.f32.mrb[17].mxu0  ;;  %v2724_v13 = vld [vmem:[%s995_s26] ss:$0 sm:$0xff]  ;;  %s4969_s26 = sld [smem:[#allocation45_spill]] }
 0x768   : > { %v1972_v17 = vadd.f32 %v1971_v15, %v1970_v14  ;;  %v1875_v18 = vpop.f32.mrb[18].mxu0 }
 0x769   : > { %v2874_v19 = vpop.f32.mrb[19].mxu0 }
 0x76a   : > { %v1918_v20 = vpop.f32.mrb[32].mxu1 }
 0x76b   : > { %v1973_v21 = vsel %vm1165_vm2, %v1918_v20, 0.0  ;;  %v2879_v22 = vpop.f32.mrb[33].mxu1 }
 0x76c   : > { %v1974_v23 = vadd.f32 %v1973_v21, %v1972_v17  ;;  %v1921_v24 = vpop.f32.mrb[34].mxu1 }
 0x76d   : > { %v2880_v25 = vpop.f32.mrb[35].mxu1  ;;  %p2735_p11 = scmp.ne.s32.totalorder %s4969_s26, 1 }
 0x76e   : > { %v1964_v26 = vpop.f32.mrb[20].mxu0 }
 0x76f   : > { %v1975_v27 = vsel %vm1165_vm2, %v1964_v26, 0.0  ;;  %v2885_v29 = vpop.f32.mrb[21].mxu0 }
 0x770   : > { %v1976_v30 = vadd.f32 %v1975_v27, %v1974_v23  ;;  %v1967_v31 = vpop.f32.mrb[22].mxu0 }
 0x771   : > { %v2886_v32 = vpop.f32.mrb[23].mxu0 }
 0x772   : > { %v1984_v33 = vadd.f32 %v2717_v28, %v1976_v30  ;;  %v2733_v30 = vld [vmem:[%s1003_s5] ss:$0 sm:$0xff] }
 0x773   : > { %v2734_v32 = vld [vmem:[%s1011_s3] ss:$0 sm:$0xff] }
 0x774   : > { %v1985_v34 = vadd.f32 %v1984_v33, %v4595_v4  ;;  %v3059_v4 = vld [vmem:[%s4567_s8] sm:$0xff]  }
 0x775   : > { %2896 = vmatpush3.bf16.msra.mxu0 %v3059_v4 }
 0x776   : > { %v1988_v35 = vsel %vm1165_vm2, %v1985_v34, 0.0  ;;  %2897 = vmatprep.subr.bf16.mxu0 %v3740_v2 }
 0x777   : > { %1989 = vadd.xlane.f32.xlu1 %v1988_v35 }
 0x779   : > { %2898 = vmatpush3.bf16.msra.mxu0 %v3060_v53 }
 0x77a   : > { %2899 = vmatprep.subr.bf16.mxu0 %v3740_v2 }
 0x77d   : > { %2900 = vmatpush3.bf16.msra.mxu0 %v3061_v54 }
 0x77e   : > { %2901 = vmatprep.subr.bf16.mxu0 %v3740_v2 }
 0x781   : > { %2902 = vmatpush3.bf16.msra.mxu0 %v3062_v55 }
 0x782   : > { %2903 = vmatprep.subr.bf16.mxu0 %v3740_v2 }
 0x785   : > { %2904 = vmatpush3.bf16.msra.mxu0 %v3063_v56 }
 0x786   : > { %2905 = vmatprep.subr.bf16.mxu0 %v3740_v2 }
 0x789   : > { %2906 = vmatpush3.bf16.msra.mxu0 %v3064_v57 }
 0x78a   : > { %2907 = vmatprep.subr.bf16.mxu0 %v3740_v2 }
 0x78d   : > { %2908 = vmatpush3.bf16.msra.mxu0 %v3065_v58 }
 0x78e   : > { %2909 = vmatprep.subr.bf16.mxu0 %v3740_v2 }
 0x791   : > { %2910 = vmatpush3.bf16.msra.mxu0 %v3066_v59 }
 0x804   : > { %v1990_v36 = vpop.xlane.xlu1 %1989 }
 0x805   : > { %v1992_v37 = vmul.f32 0.03125, %v1990_v36 }
 0x807   : > { %v1993_v38 = vsub.f32 %v1985_v34, %v1992_v37 }
 0x809   : > { %v1994_v39 = vmul.f32 %v1993_v38, %v1993_v38 }
 0x80b   : > { %v1995_v40 = vsel %vm1165_vm2, %v1994_v39, 0.0 }
 0x80c   : > { %1996 = vadd.xlane.f32.xlu0 %v1995_v40 }
 0x899   : > { %v1997_v43 = vpop.xlane.xlu0 %1996 }
 0x89a   : > { %v1998_v44 = vmul.f32 0.03125, %v1997_v43 }
 0x89c   : > { %v1999_v45 = vadd.f32 1e-05, %v1998_v44 }
 0x89e   : > { %3083 = vrsqrt.f32 %v1999_v45 }
 0x8a8   : > { %v3084_v46 = vpop.eup %3083 }
 0x8a9   : > { %v2001_v48 = vmul.f32 %v3084_v46, %v1993_v38 }
 0x8ab   : > { %v2008_v50 = vmul.f32 %v2718_v47, %v2001_v48 }
 0x8ad   : > { %v2015_v51 = vadd.f32 %v2719_v49, %v2008_v50 }
 0x8af   : > { %v2016_v52 = vpack.c.bf16 %v2015_v51, %v2015_v51 }
 0x8b1   : > { %2892 = vmatmul.mubr.msk.bf16.vlgmr.msra.gmra.mrb[36].mxu1 %vm1165_vm2, %v2016_v52 }
 0x984   : > { %v2077_v61 = vpop.f32.mrb[36].mxu1 }
 0x985   : > { %v2078_v62 = vadd.f32 %v2720_v60, %v2077_v61  ;;  %v2893_v63 = vpop.f32.mrb[37].mxu1 }
 0x986   : > { %v2080_v0 = vpop.f32.mrb[38].mxu1 }
 0x987   : > { %v2084_v1 = vmul.f32 0.044715, %v2078_v62  ;;  %v2894_v3 = vpop.f32.mrb[39].mxu1  ;;  %v2083_v10 = vmul.f32 0.5, %v2078_v62 }
 0x989   : > { %v2085_v5 = vmul.f32 %v2084_v1, %v2078_v62 }
 0x98b   : > { %v2086_v6 = vmul.f32 %v2085_v5, %v2078_v62 }
 0x98d   : > { %v2087_v7 = vadd.f32 %v2086_v6, %v2078_v62 }
 0x98f   : > { %v2088_v8 = vmul.f32 0.7978846, %v2087_v7 }
 0x991   : > { %3085 = vtanh.f32 %v2088_v8 }
 0x99b   : > { %v3086_v9 = vpop.eup %3085 }
 0x99c   : > { %v2090_v11 = vadd.f32 1.0, %v3086_v9 }
 0x99e   : > { %v2091_v12 = vmul.f32 %v2090_v11, %v2083_v10 }
 0x9a0   : > { %v2092_v2 = vpack.c.bf16 %v2091_v12, %v2091_v12 }
 0x9a2   : > { %2912 = vmatmul.mubr.bf16.vlgmr.msra.gmra.mrb[24].mxu0 %v2092_v2 }
 0xa75   : > { %v2198_v14 = vpop.f32.mrb[24].mxu0 }
 0xa76   : > { %v2199_v15 = vadd.f32 %v2724_v13, %v2198_v14  ;;  %v2913_v16 = vpop.f32.mrb[25].mxu0 }
 0xa77   : > { %v2201_v17 = vpop.f32.mrb[26].mxu0 }
 0xa78   : > { %v2914_v18 = vpop.f32.mrb[27].mxu0  ;;  %v2204_v19 = vadd.f32 %v2199_v15, %v2015_v51 }
 0xa7a   : > { %v2207_v20 = vsel %vm1165_vm2, %v2204_v19, 0.0 }
 0xa7b   : > { %2208 = vadd.xlane.f32.xlu0 %v2207_v20 }
 0xb08   : > { %v2209_v21 = vpop.xlane.xlu0 %2208 }
 0xb09   : > { %v2210_v22 = vmul.f32 0.03125, %v2209_v21 }
 0xb0b   : > { %v2211_v23 = vsub.f32 %v2204_v19, %v2210_v22 }
 0xb0d   : > { %v2212_v24 = vmul.f32 %v2211_v23, %v2211_v23 }
 0xb0f   : > { %v2213_v25 = vsel %vm1165_vm2, %v2212_v24, 0.0 }
 0xb10   : > { %2214 = vadd.xlane.f32.xlu1 %v2213_v25 }
 0xb9d   : > { %v2215_v26 = vpop.xlane.xlu1 %2214 }
 0xb9e   : > { %v2216_v27 = vmul.f32 0.03125, %v2215_v26 }
 0xba0   : > { %v2217_v28 = vadd.f32 1e-05, %v2216_v27 }
 0xba2   : > { %3087 = vrsqrt.f32 %v2217_v28 }
 0xbac   : > { %v3088_v29 = vpop.eup %3087 }
 0xbad   : > { %v2219_v31 = vmul.f32 %v3088_v29, %v2211_v23  ;;  %2238 = sbr.rel (%p2735_p11) target bundleno = 2996 (0xbb4), region = 164 }
 0xbaf   : > { %v2226_v33 = vmul.f32 %v2733_v30, %v2219_v31 }
 0xbb1   : > { %v2233_v34 = vadd.f32 %v2734_v32, %v2226_v33 }
 0xbb3   : > { %2234 = vst.msk [vmem:[#allocation2] sm:$0xff] %vm1165_vm2, %v2233_v34  ;;  %2239 = vst.msk [vmem:[%s4583_s27] sm:$0xff] (!%p2735_p11), %vm1165_vm2, %v2233_v34 }
 0xbb4 PF: > { %s4970_s8 = sld [smem:[#allocation46_spill]]  ;;  %s4971_s2 = sld [smem:[#allocation54_spill]] }
 0xbb5   : > { %s4972_s24 = sld [smem:[#allocation68_spill]]  ;;  %s2254_s28 = sshll.u32 %s4583_s27, 4  ;;  %s2255_s28 = int_to_ptr.vmem [resolvable:$true] %s2254_s28 }
 0xbb6   : > { %s2241_s25 = scalar_lea.sflag [#allocation5], %s4500_s4  ;;  %s3565_s30 = scalar_lea.vmem %s2255_s28, 128 }
 0xbb7   : > { %p3566_p1 = scmp.ne.s32.totalorder %s2255_s28, %s3565_s30  ;;  %s3745_s14 = smov [#allocation30]  }
 0xbb8   : > { %s3569_s10 = sshll.u32 %s3745_s14, 4  ;;  %s3570_s10 = int_to_ptr.vmem [resolvable:$false] %s3569_s10 }
 0xbb9   : > { %s3571_s26 = scalar_lea.vmem %s3570_s10, 256  ;;  %p3572_p8 = scmp.lt.s32.totalorder %s2255_s28, %s3570_s10 }
 0xbba   : > { %s2737_s0 = sshll.u32 %s4970_s8, 7  ;;  %p4974_p13 = scmp.ne.s32.totalorder %s4971_s2, 0 }
 0xbbb   : > { %s4973_s12 = smov %s4972_s24  ;;  %s4769_s3 = scalar_lea.hbm %s4972_s24, %s2737_s0 }
 0xbbc   : > { %p3567_p2 = pnand %p3566_p1, %p4974_p13  ;;  %p3573_p6 = scmp.lt.s32.totalorder %s3571_s26, %s3565_s30 }
 0xbbe   : > { %p3568_p0 = pneg %p3567_p2  ;;  %p3574_p3 = por %p3573_p6, %p3572_p8 }
 0xbc0   : > { %p3575_p4 = pnand %p3574_p3, %p3568_p0 }
 0xbc2   : > { %3578 = shalt.err (!%p3575_p4)
}
 0xbc3   : > { %s3579_s4 = scalar_lea.hbm %s4769_s3, 128  ;;  %s3583_s0 = scalar_lea.hbm %s4973_s12, 256 }
 0xbc4   : > { %p3580_p7 = scmp.ne.s32.totalorder %s4769_s3, %s3579_s4  ;;  %p3584_p5 = scmp.lt.u32.totalorder %s4769_s3, %s4973_s12 }
 0xbc5   : > { %p3585_p10 = scmp.lt.u32.totalorder %s3583_s0, %s3579_s4  ;;  %p3587_p1 = scmp.lt.u32.totalorder %s3579_s4, %s4769_s3 }
 0xbc6   : > { %p3581_p12 = pnand %p3580_p7, %p4974_p13 }
 0xbc7   : > { %p3586_p11 = por %p3585_p10, %p3584_p5 }
 0xbc8   : > { %p3582_p9 = pneg %p3581_p12 }
 0xbc9   : > { %p3588_p2 = por %p3587_p1, %p3586_p11 }
 0xbcb   : > { %p3589_p0 = pnand %p3588_p2, %p3582_p9 }
 0xbcd   : > { %3592 = shalt.err (!%p3589_p0)
}
 0xbce   : > { %2949 = dma.vmem_to_hbm [thread:$0]  (%p4974_p13), %s2255_s28, 128, %s4769_s3, %s2241_s25  }
 0xbcf PF: > { %s4975_s24 = sld [smem:[#allocation43_spill]]  ;;  %s4976_s30 = sld [smem:[#allocation55_spill]] }
 0xbd0   : > { %p2955_p8 = scmp.ge.s32.totalorder %s3719_s1, 2 }
 0xbd5   : > { %s2266_s14 = sand.u32 1, %s4975_s24   ;;  %p4977_p6 = scmp.ne.s32.totalorder %s4976_s30, 0 }
 0xbd6   : > { %s2267_s10 = scalar_lea.sflag [#allocation5], %s2266_s14 }
 0xbd7   : > { %p2952_p3 = pnand %p2955_p8, %p4977_p6 }
 0xbd9   : > { %3674 = dma.done.wait (!%p2952_p3), %s2267_s10, 128  }
 0xbda   : > { %3676 = vsyncadd (!%p2952_p3), %s2267_s10, 4294967168  ;;  %s57_s1 = sadd.s32 1, %s3719_s1   ;;  %s4978_s24 = sld [smem:[#allocation41_spill]] }
 0xbdb   : > { %p54_p4 = scmp.ge.s32.totalorder %s57_s1, 6   ;;  %s4979_s25 = sld [smem:[#allocation42_spill]] }
 0xbdc   : > { %s4980_s26 = sld [smem:[#allocation51_spill]]  ;;  %s4981_s27 = sld [smem:[#allocation44_spill]] }
 0xbdd   : > { %s4982_s2 = sld [smem:[#allocation52_spill]]  ;;  %s4983_s3 = sld [smem:[#allocation48_spill]] }
 0xbde   : > { %s4984_s4 = sld [smem:[#allocation49_spill]]  ;;  %s4985_s28 = smov %s3699_s29 }
 0xbdf   : > { %s4987_s0 = smov %s3711_s18  ;;  %s4988_s30 = smov %s3715_s19 }
 0xbe0   :  { %56 = sbr.rel (!%p54_p4) target bundleno = 39 (0x27), region = 333 }
 0xbe3   : > { %s4986_s29 = smov %s4982_s2  ;;  %s4989_s18 = smov %s4983_s3 }
 0xbe4   : > { %s4990_s19 = smov %s4984_s4 }
 0xbe7   :  { %2272 = vsyncpa [#allocation4], 1 }
 0xbe8   :  { %2274 = vsyncpa [#allocation4 + $0x1], 1 }
 0xbe9   :  { %2275 = vsyncpa [#allocation7], 1 }
 0xbea   :  { %2277 = vsyncpa [#allocation7 + $0x1], 1 }
 0xbeb   :  { %2278 = vsyncpa [#allocation10], 1 }
 0xbec   :  { %2280 = vsyncpa [#allocation10 + $0x1], 1 }
 0xbed   :  { %2281 = vsyncpa [#allocation13], 1 }
 0xbee   :  { %2283 = vsyncpa [#allocation13 + $0x1], 1 }
 0xbef   :  { %2284 = vsyncpa [#allocation16], 1 }
 0xbf0   :  { %2286 = vsyncpa [#allocation16 + $0x1], 1 }
 0xbf1   :  { %2287 = vsyncpa [#allocation19], 1 }
 0xbf2   :  { %2289 = vsyncpa [#allocation19 + $0x1], 1 }
 0xbf3   :  { %2290 = vsyncpa [#allocation22], 1 }
 0xbf4   :  { %2292 = vsyncpa [#allocation22 + $0x1], 1 }
 0xbf5   :  { %2293 = vsyncpa [#allocation25], 1 }
 0xbf6   :  { %2295 = vsyncpa [#allocation25 + $0x1], 1 }
 0xbf7   :  { %2296 = vsyncpa [#allocation28], 1 }
 0xbf8   :  { %2298 = vsyncpa [#allocation28 + $0x1], 1 }
 0xbf9   :  { %2299 = vsyncpa [#allocation5], 1 }
 0xbfa   :  { %2301 = vsyncpa [#allocation5 + $0x1], 1 }

</bundles_post_ra>
